<compile_context>
chip_gen: v7x
topology: tpu7x:2x2x1
jax: 0.10.0
libtpu: 0.0.40
codegen_flags: <defaults>
</compile_context>

<pallas_src>
import functools
import math

import jax
import jax.numpy as jnp
from jax import lax
from jax.experimental import pallas as pl
from jax.experimental.pallas import tpu as pltpu


# ---------------------------------------------------------------------------
# VMEM capacity / tiling helpers
# ---------------------------------------------------------------------------
def _query_vmem_cap():
    try:
        cap = int(pltpu.get_tpu_info().vmem_capacity_bytes)
    except Exception:
        cap = 64 * 1024 * 1024  # conservative (v7x per-core) fallback
    return max(32 * 1024 * 1024, min(cap, 128 * 1024 * 1024))


_VMEM_CAP = _query_vmem_cap()
_VMEM_BUDGET = int(_VMEM_CAP * 0.40)                       # per-call working set target
_VMEM_LIMIT = int(min(_VMEM_CAP * 0.75, 100 * 1024 * 1024))  # compiler scoped-VMEM limit


def _max_rows_under(H, est_fn, budget):
    """Largest row-tile TH in [1, H] whose estimated VMEM use fits the budget."""
    th = 1
    for cand in range(1, H + 1):
        if est_fn(cand) <= budget:
            th = cand
        else:
            break
    return th


def _choose_tile_rows(H, th_max):
    """Pick TH <= th_max minimizing padded height (prefers exact divisors)."""
    th_max = max(1, min(th_max, H))
    best_key, best_th = None, 1
    for th in range(1, th_max + 1):
        hpad = -(-H // th) * th
        key = (hpad, -th)
        if best_key is None or key < best_key:
            best_key, best_th = key, th
    return best_th, best_key[0]


# ---------------------------------------------------------------------------
# Pallas conv2d: stride 1, 'same' padding (K//2), NHWC, fused bias+activation.
# Manual double-buffered row-slab DMA + per-dy im2col matmuls on the MXU.
# ---------------------------------------------------------------------------
def _conv_kernel(x_hbm, w_ref, b_ref, o_ref, xbuf, sem,
                 *, K, TH, T, W, Cin, Cout, act):
    n = pl.program_id(0)
    t = pl.program_id(1)
    rows = TH + K - 1
    slot = t % 2

    def _start(tile, s):
        pltpu.make_async_copy(
            x_hbm.at[n, pl.ds(tile * TH, rows)], xbuf.at[s], sem.at[s]).start()

    @pl.when(t == 0)              # first row-tile of this image: issue current slab
    def _():
        _start(0, 0)

    @pl.when(t + 1 < T)           # prefetch next row-tile of the same image
    def _():
        _start(t + 1, 1 - slot)

    pltpu.make_async_copy(
        x_hbm.at[n, pl.ds(t * TH, rows)], xbuf.at[slot], sem.at[slot]).wait()

    acc = jnp.zeros((TH * W, Cout), jnp.float32)
    for dy in range(K):
        pieces = [xbuf[slot, dy:dy + TH, dx:dx + W, :] for dx in range(K)]
        patch = pieces[0] if K == 1 else jnp.concatenate(pieces, axis=-1)
        acc = acc + jnp.dot(patch.reshape(TH * W, K * Cin), w_ref[dy],
                            preferred_element_type=jnp.float32)
    acc = acc + b_ref[...]
    if act == "relu":
        acc = jnp.maximum(acc, 0.0)
    elif act == "lrelu":
        acc = jnp.where(acc >= 0.0, acc, 0.1 * acc)
    o_ref[...] = acc.reshape(1, TH, W, Cout)


@functools.partial(jax.jit, static_argnames=("act",))
def conv2d_nhwc(x, w, b, act="none"):
    """x: (N,H,W,Cin) f32, w: (K,K,Cin,Cout), b: (Cout,) -> (N,H,W,Cout) f32."""
    K = w.shape[0]
    pad = K // 2
    N, H, W, Cin = x.shape
    Cout = w.shape[3]
    Wp = W + 2 * pad

    def est(th):
        return 4 * (2 * (th + K - 1) * Wp * Cin        # double-buffered input slab
                    + 2 * th * W * Cout                # double-buffered output block
                    + th * W * (2 * K * Cin + 3 * Cout)  # im2col patches + accumulators
                    + 2 * K * K * Cin * Cout           # double-buffered weights
                    ) + (2 << 20)

    th_max = _max_rows_under(H, est, _VMEM_BUDGET)
    TH, Hpad = _choose_tile_rows(H, th_max)
    T = Hpad // TH

    xp = jnp.pad(x, ((0, 0), (pad, pad + (Hpad - H)), (pad, pad), (0, 0)))
    wcat = w.reshape(K, K * Cin, Cout)                 # merge dx into the contraction
    b2 = b.reshape(1, Cout)

    kernel = functools.partial(_conv_kernel, K=K, TH=TH, T=T, W=W,
                               Cin=Cin, Cout=Cout, act=act)
    out = pl.pallas_call(
        kernel,
        out_shape=jax.ShapeDtypeStruct((N, Hpad, W, Cout), jnp.float32),
        grid_spec=pltpu.PrefetchScalarGridSpec(
            num_scalar_prefetch=0,
            grid=(N, T),
            in_specs=[
                pl.BlockSpec(memory_space=pl.ANY),      # padded input stays in HBM
                pl.BlockSpec((K, K * Cin, Cout), lambda n, t: (0, 0, 0)),
                pl.BlockSpec((1, Cout), lambda n, t: (0, 0)),
            ],
            out_specs=pl.BlockSpec((1, TH, W, Cout), lambda n, t: (n, t, 0, 0)),
            scratch_shapes=[
                pltpu.VMEM((2, TH + K - 1, Wp, Cin), jnp.float32),
                pltpu.SemaphoreType.DMA((2,)),
            ],
        ),
        compiler_params=pltpu.CompilerParams(
            dimension_semantics=("parallel", "arbitrary"),
            vmem_limit_bytes=_VMEM_LIMIT,
        ),
        cost_estimate=pl.CostEstimate(
            flops=int(2 * N * Hpad * W * K * K * Cin * Cout),
            transcendentals=0,
            bytes_accessed=int(4 * (N * (Hpad + 2 * pad) * Wp * Cin
                                    + N * Hpad * W * Cout + K * K * Cin * Cout)),
        ),
    )(xp, wcat, b2)
    if Hpad != H:
        out = out[:, :H]
    return out


# ---------------------------------------------------------------------------
# Fused ResidualBlockNoBN: x + conv2(relu(conv1(x))) in a single pallas_call.
# The conv1 output (with its zero halo for conv2) never leaves VMEM.
# ---------------------------------------------------------------------------
def _resblock_kernel(x_hbm, w1_ref, b1_ref, w2_ref, b2_ref, o_ref, xbuf, sem,
                     *, TH, T, W, H, C):
    n = pl.program_id(0)
    t = pl.program_id(1)
    rows_in = TH + 4
    rows_mid = TH + 2
    slot = t % 2

    def _start(tile, s):
        pltpu.make_async_copy(
            x_hbm.at[n, pl.ds(tile * TH, rows_in)], xbuf.at[s], sem.at[s]).start()

    @pl.when(t == 0)
    def _():
        _start(0, 0)

    @pl.when(t + 1 < T)
    def _():
        _start(t + 1, 1 - slot)

    pltpu.make_async_copy(
        x_hbm.at[n, pl.ds(t * TH, rows_in)], xbuf.at[slot], sem.at[slot]).wait()

    # conv1 (+bias, ReLU) over TH+2 rows (output rows plus conv2's row halo).
    acc1 = jnp.zeros((rows_mid * W, C), jnp.float32)
    for dy in range(3):
        pieces = [xbuf[slot, dy:dy + rows_mid, 1 + dx:1 + dx + W, :] for dx in range(3)]
        patch = jnp.concatenate(pieces, axis=-1).reshape(rows_mid * W, 3 * C)
        acc1 = acc1 + jnp.dot(patch, w1_ref[dy], preferred_element_type=jnp.float32)
    acc1 = jnp.maximum(acc1 + b1_ref[...], 0.0)
    mid = acc1.reshape(rows_mid, W, C)

    # Rows outside the true image are conv2's zero padding -> mask them to zero.
    g = t * TH - 1 + lax.broadcasted_iota(jnp.int32, (rows_mid, 1, 1), 0)
    valid = jnp.logical_and(g >= 0, g <= H - 1)
    mid = jnp.where(valid, mid, 0.0)

    # Zero-pad width by 1 on each side for conv2 (kept in VMEM).
    zcol = jnp.zeros((rows_mid, 1, C), jnp.float32)
    midp = jnp.concatenate([zcol, mid, zcol], axis=1)

    # conv2 (+bias) and residual add.
    acc2 = jnp.zeros((TH * W, C), jnp.float32)
    for dy in range(3):
        pieces = [midp[dy:dy + TH, dx:dx + W, :] for dx in range(3)]
        patch = jnp.concatenate(pieces, axis=-1).reshape(TH * W, 3 * C)
        acc2 = acc2 + jnp.dot(patch, w2_ref[dy], preferred_element_type=jnp.float32)
    acc2 = acc2 + b2_ref[...]
    res = xbuf[slot, 2:2 + TH, 2:2 + W, :].reshape(TH * W, C)
    o_ref[...] = (acc2 + res).reshape(1, TH, W, C)


@jax.jit
def resblock_nhwc(x, w1, b1, w2, b2):
    """ResidualBlockNoBN: x + conv2(relu(conv1(x))).  x: (N,H,W,C)."""
    N, H, W, C = x.shape
    Wp = W + 4

    def est(th):
        return 4 * (2 * (th + 4) * Wp * C
                    + 2 * th * W * C
                    + 2 * (th + 2) * (W + 2) * C
                    + 4 * (th + 2) * W * C
                    + 4 * th * W * C
                    + 4 * 9 * C * C) + (2 << 20)

    th_max = _max_rows_under(H, est, _VMEM_BUDGET)
    TH, Hpad = _choose_tile_rows(H, th_max)
    T = Hpad // TH

    xp = jnp.pad(x, ((0, 0), (2, 2 + (Hpad - H)), (2, 2), (0, 0)))
    w1c = w1.reshape(3, 3 * C, C)
    w2c = w2.reshape(3, 3 * C, C)
    b1r = b1.reshape(1, C)
    b2r = b2.reshape(1, C)

    kernel = functools.partial(_resblock_kernel, TH=TH, T=T, W=W, H=H, C=C)
    out = pl.pallas_call(
        kernel,
        out_shape=jax.ShapeDtypeStruct((N, Hpad, W, C), jnp.float32),
        grid_spec=pltpu.PrefetchScalarGridSpec(
            num_scalar_prefetch=0,
            grid=(N, T),
            in_specs=[
                pl.BlockSpec(memory_space=pl.ANY),
                pl.BlockSpec((3, 3 * C, C), lambda n, t: (0, 0, 0)),
                pl.BlockSpec((1, C), lambda n, t: (0, 0)),
                pl.BlockSpec((3, 3 * C, C), lambda n, t: (0, 0, 0)),
                pl.BlockSpec((1, C), lambda n, t: (0, 0)),
            ],
            out_specs=pl.BlockSpec((1, TH, W, C), lambda n, t: (n, t, 0, 0)),
            scratch_shapes=[
                pltpu.VMEM((2, TH + 4, Wp, C), jnp.float32),
                pltpu.SemaphoreType.DMA((2,)),
            ],
        ),
        compiler_params=pltpu.CompilerParams(
            dimension_semantics=("parallel", "arbitrary"),
            vmem_limit_bytes=_VMEM_LIMIT,
        ),
        cost_estimate=pl.CostEstimate(
            flops=int(2 * 2 * N * Hpad * W * 9 * C * C),
            transcendentals=0,
            bytes_accessed=int(4 * (N * (Hpad + 4) * Wp * C
                                    + N * Hpad * W * C + 2 * 9 * C * C)),
        ),
    )(xp, w1c, b1r, w2c, b2r)
    if Hpad != H:
        out = out[:, :H]
    return out


# ---------------------------------------------------------------------------
# Plain-JAX glue ops (gather-style data movement; no clean Pallas equivalent).
# ---------------------------------------------------------------------------
def lrelu(x):
    return jnp.where(x >= 0.0, x, 0.1 * x)


def pixel_shuffle_nhwc(x, r):
    N, H, W, C = x.shape
    c = C // (r * r)
    x = x.reshape(N, H, W, c, r, r)
    x = jnp.transpose(x, (0, 1, 4, 2, 5, 3))
    return x.reshape(N, H * r, W * r, c)


def _resize_indices(in_size, out_size, align_corners):
    if align_corners:
        if out_size == 1:
            src = jnp.zeros((1,), jnp.float32)
        else:
            src = jnp.arange(out_size, dtype=jnp.float32) * ((in_size - 1) / (out_size - 1))
    else:
        scale = in_size / out_size
        src = (jnp.arange(out_size, dtype=jnp.float32) + 0.5) * scale - 0.5
        src = jnp.maximum(src, 0.0)
    i0 = jnp.clip(jnp.floor(src).astype(jnp.int32), 0, in_size - 1)
    i1 = jnp.minimum(i0 + 1, in_size - 1)
    frac = src - i0.astype(jnp.float32)
    return i0, i1, frac


def resize_bilinear_nhwc(x, out_h, out_w, align_corners):
    """Matches F.interpolate(mode='bilinear') semantics (NHWC)."""
    y0, y1, fy = _resize_indices(x.shape[1], out_h, align_corners)
    x0, x1, fx = _resize_indices(x.shape[2], out_w, align_corners)
    top = jnp.take(x, y0, axis=1)
    bot = jnp.take(x, y1, axis=1)
    v = top * (1.0 - fy)[None, :, None, None] + bot * fy[None, :, None, None]
    left = jnp.take(v, x0, axis=2)
    right = jnp.take(v, x1, axis=2)
    return left * (1.0 - fx)[None, None, :, None] + right * fx[None, None, :, None]


def avg_pool2_nhwc(x):
    N, H, W, C = x.shape
    return x.reshape(N, H // 2, 2, W // 2, 2, C).mean(axis=(2, 4))


def flow_warp_nhwc(x, flow, padding_mode="zeros"):
    """basicsr flow_warp: bilinear grid_sample, align_corners=True."""
    N, H, W, C = x.shape
    gy, gx = jnp.meshgrid(jnp.arange(H, dtype=jnp.float32),
                          jnp.arange(W, dtype=jnp.float32), indexing="ij")
    vx = gx[None] + flow[..., 0]
    vy = gy[None] + flow[..., 1]
    if padding_mode == "border":
        vx = jnp.clip(vx, 0.0, float(W - 1))
        vy = jnp.clip(vy, 0.0, float(H - 1))
    x0 = jnp.floor(vx)
    y0 = jnp.floor(vy)
    x1 = x0 + 1.0
    y1 = y0 + 1.0
    wx1 = vx - x0
    wx0 = 1.0 - wx1
    wy1 = vy - y0
    wy0 = 1.0 - wy1
    xf = x.reshape(N, H * W, C)

    def sample(yi, xi, wgt):
        if padding_mode == "zeros":
            inb = (xi >= 0.0) & (xi <= W - 1.0) & (yi >= 0.0) & (yi <= H - 1.0)
            wgt = wgt * inb.astype(x.dtype)
        yc = jnp.clip(yi, 0.0, H - 1.0).astype(jnp.int32)
        xc = jnp.clip(xi, 0.0, W - 1.0).astype(jnp.int32)
        flat = (yc * W + xc).reshape(N, H * W, 1)
        vals = jnp.take_along_axis(xf, flat, axis=1).reshape(N, H, W, C)
        return vals * wgt[..., None]

    return (sample(y0, x0, wy0 * wx0) + sample(y0, x1, wy0 * wx1)
            + sample(y1, x0, wy1 * wx0) + sample(y1, x1, wy1 * wx1))


# ---------------------------------------------------------------------------
# SpyNet (architecture reproduced; weights are deterministic random init).
# TODO(synk): pretrained SPyNet weights cannot be loaded in-script; random init.
# ---------------------------------------------------------------------------
_SPY_MEAN = jnp.array([0.485, 0.456, 0.406], jnp.float32).reshape(1, 1, 1, 3)
_SPY_STD = jnp.array([0.229, 0.224, 0.225], jnp.float32).reshape(1, 1, 1, 3)


def _spynet_basic_module(level_params, x):
    # TODO(synk): the 5 chained 7x7 convs are not fused into one pallas_call.
    acts = ("relu", "relu", "relu", "relu", "none")
    for (w, b), act in zip(level_params, acts):
        x = conv2d_nhwc(x, w, b, act=act)
    return x


def spynet_process(params, ref, supp):
    ref_l = [(ref - _SPY_MEAN) / _SPY_STD]
    supp_l = [(supp - _SPY_MEAN) / _SPY_STD]
    for _ in range(5):
        ref_l.insert(0, avg_pool2_nhwc(ref_l[0]))
        supp_l.insert(0, avg_pool2_nhwc(supp_l[0]))
    N = ref.shape[0]
    flow = jnp.zeros((N, ref_l[0].shape[1] // 2, ref_l[0].shape[2] // 2, 2),
                     jnp.float32)
    for level in range(len(ref_l)):
        h_t, w_t = ref_l[level].shape[1], ref_l[level].shape[2]
        up = resize_bilinear_nhwc(flow, flow.shape[1] * 2, flow.shape[2] * 2,
                                  align_corners=True) * 2.0
        if up.shape[1] != h_t:
            up = jnp.pad(up, ((0, 0), (0, 1), (0, 0), (0, 0)), mode="edge")
        if up.shape[2] != w_t:
            up = jnp.pad(up, ((0, 0), (0, 0), (0, 1), (0, 0)), mode="edge")
        warped = flow_warp_nhwc(supp_l[level], up, padding_mode="border")
        inp = jnp.concatenate([ref_l[level], warped, up], axis=-1)
        flow = _spynet_basic_module(params[level], inp) + up
    return flow


def spynet_forward(params, ref, supp):
    N, H, W, _ = ref.shape
    w_floor = int(math.floor(math.ceil(W / 32.0) * 32.0))
    h_floor = int(math.floor(math.ceil(H / 32.0) * 32.0))
    ref_r = resize_bilinear_nhwc(ref, h_floor, w_floor, align_corners=False)
    supp_r = resize_bilinear_nhwc(supp, h_floor, w_floor, align_corners=False)
    flow = spynet_process(params, ref_r, supp_r)
    flow = resize_bilinear_nhwc(flow, H, W, align_corners=False)
    scale = jnp.array([W / w_floor, H / h_floor], jnp.float32).reshape(1, 1, 1, 2)
    return flow * scale


# ---------------------------------------------------------------------------
# ConvResidualBlocks (first conv + fused residual blocks)
# ---------------------------------------------------------------------------
def conv_residual_blocks(trunk_params, x):
    (w0, b0), blocks = trunk_params
    x = conv2d_nhwc(x, w0, b0, act="lrelu")
    for (w1, b1), (w2, b2) in blocks:
        x = resblock_nhwc(x, w1, b1, w2, b2)
    return x


# ---------------------------------------------------------------------------
# Parameter init (deterministic, in-script)
# ---------------------------------------------------------------------------
class _KeyGen:
    def __init__(self, key):
        self._key = key

    def __call__(self):
        self._key, sub = jax.random.split(self._key)
        return sub


def _init_conv(kg, k, cin, cout):
    fan_in = k * k * cin
    w = jax.random.normal(kg(), (k, k, cin, cout), jnp.float32) / math.sqrt(fan_in)
    b = 0.01 * jax.random.normal(kg(), (cout,), jnp.float32)
    return w, b


def init_cvsr3_params(key, num_feat=64, num_block=30):
    kg = _KeyGen(key)
    spy_cfg = [(7, 8, 32), (7, 32, 64), (7, 64, 32), (7, 32, 16), (7, 16, 2)]
    spynet = [[_init_conv(kg, *c) for c in spy_cfg] for _ in range(6)]

    def trunk(cin):
        first = _init_conv(kg, 3, cin, num_feat)
        blocks = [(_init_conv(kg, 3, num_feat, num_feat),
                   _init_conv(kg, 3, num_feat, num_feat))
                  for _ in range(num_block)]
        return (first, blocks)

    return {
        "num_feat": num_feat,
        "spynet": spynet,
        "backward_trunk": trunk(num_feat + 3),
        "forward_trunk": trunk(num_feat + 3),
        "fusionR": _init_conv(kg, 1, num_feat, num_feat),
        "fusionI": _init_conv(kg, 1, num_feat, num_feat),
        "upconv1R": _init_conv(kg, 3, num_feat, num_feat * 4),
        "upconv1I": _init_conv(kg, 3, num_feat, num_feat * 4),
        "upconv2R": _init_conv(kg, 3, num_feat, 64 * 4),
        "upconv2I": _init_conv(kg, 3, num_feat, 64 * 4),
        "conv_hrR": _init_conv(kg, 3, 64, 64),
        "conv_hrI": _init_conv(kg, 3, 64, 64),
        "conv_lastR": _init_conv(kg, 3, 64, 3),
        "conv_lastI": _init_conv(kg, 3, 64, 3),
    }


def _cat_ri(pR, pI):
    """Concatenate R/I conv weights along Cout so each input is convolved once."""
    (wR, bR), (wI, bI) = pR, pI
    return jnp.concatenate([wR, wI], axis=3), jnp.concatenate([bR, bI], axis=0)


# ---------------------------------------------------------------------------
# CVSR3 forward
# ---------------------------------------------------------------------------
def cvsr3_forward(params, x, phase_rot):
    """x: (b, n, 3, h, w) (NCHW like PyTorch). Returns (b, n, 6, 4h, 4w)."""
    num_feat = params["num_feat"]
    b, n, c, h, w = x.shape
    xh = jnp.transpose(x, (0, 1, 3, 4, 2)).astype(jnp.float32)   # (b, n, h, w, 3)

    # get_flow
    x1 = xh[:, :-1].reshape(b * (n - 1), h, w, c)
    x2 = xh[:, 1:].reshape(b * (n - 1), h, w, c)
    flows_backward = spynet_forward(params["spynet"], x1, x2).reshape(b, n - 1, h, w, 2)
    flows_forward = spynet_forward(params["spynet"], x2, x1).reshape(b, n - 1, h, w, 2)

    att = jnp.transpose(phase_rot, (0, 2, 3, 1)).astype(jnp.float32)
    attcos = jnp.cos(att)
    attsin = jnp.sin(att)

    # Fused R/I weights (one conv per input, split channels afterwards).
    fus_w, fus_b = _cat_ri(params["fusionR"], params["fusionI"])
    up1_w, up1_b = _cat_ri(params["upconv1R"], params["upconv1I"])
    up2_w, up2_b = _cat_ri(params["upconv2R"], params["upconv2I"])
    hr_w, hr_b = _cat_ri(params["conv_hrR"], params["conv_hrI"])
    last_w, last_b = _cat_ri(params["conv_lastR"], params["conv_lastI"])

    # backward propagation
    out_l = [None] * n
    feat_prop = jnp.zeros((b, h, w, num_feat), jnp.float32)
    for i in range(n - 1, -1, -1):
        x_i = xh[:, i]
        if i < n - 1:
            feat_prop = flow_warp_nhwc(feat_prop, flows_backward[:, i], padding_mode="zeros")
        feat_prop = jnp.concatenate([x_i, feat_prop], axis=-1)
        feat_prop = conv_residual_blocks(params["backward_trunk"], feat_prop)
        out_l[i] = feat_prop

    # forward propagation + reconstruction
    feat_prop = jnp.zeros_like(feat_prop)
    outs = []
    for i in range(n):
        x_i = xh[:, i]
        if i > 0:
            feat_prop = flow_warp_nhwc(feat_prop, flows_forward[:, i - 1], padding_mode="zeros")
        feat_prop = jnp.concatenate([x_i, feat_prop], axis=-1)
        feat_prop = conv_residual_blocks(params["forward_trunk"], feat_prop)

        # fusion (1x1, R/I fused along Cout)
        Fa = conv2d_nhwc(feat_prop, fus_w, fus_b)          # [fR(fp), fI(fp)]
        Fb = conv2d_nhwc(out_l[i], fus_w, fus_b)           # [fR(bw), fI(bw)]
        fRa, fIa = jnp.split(Fa, 2, axis=-1)
        fRb, fIb = jnp.split(Fb, 2, axis=-1)
        outR = lrelu(fRa - fIb)
        outI = lrelu(fRb + fIa)

        # upconv1 + pixel shuffle
        U1R = conv2d_nhwc(outR, up1_w, up1_b)
        U1I = conv2d_nhwc(outI, up1_w, up1_b)
        u1R_R, u1I_R = jnp.split(U1R, 2, axis=-1)
        u1R_I, u1I_I = jnp.split(U1I, 2, axis=-1)
        outRup = lrelu(pixel_shuffle_nhwc(u1R_R - u1I_I, 2))
        outIup = lrelu(pixel_shuffle_nhwc(u1R_I + u1I_R, 2))

        # upconv2 + pixel shuffle
        U2R = conv2d_nhwc(outRup, up2_w, up2_b)
        U2I = conv2d_nhwc(outIup, up2_w, up2_b)
        u2R_R, u2I_R = jnp.split(U2R, 2, axis=-1)
        u2R_I, u2I_I = jnp.split(U2I, 2, axis=-1)
        outRup_2 = lrelu(pixel_shuffle_nhwc(u2R_R - u2I_I, 2))
        outIup_2 = lrelu(pixel_shuffle_nhwc(u2R_I + u2I_R, 2))

        # phase rotation
        outRup_5 = outRup_2 * attcos - outIup_2 * attsin
        outIup_5 = outRup_2 * attsin + outIup_2 * attcos

        # conv_hr
        HRR = conv2d_nhwc(outRup_5, hr_w, hr_b)
        HRI = conv2d_nhwc(outIup_5, hr_w, hr_b)
        hR_R, hI_R = jnp.split(HRR, 2, axis=-1)
        hR_I, hI_I = jnp.split(HRI, 2, axis=-1)
        outRup_3 = lrelu(hR_R - hI_I)
        outIup_3 = lrelu(hR_I + hI_R)

        # conv_last
        LR = conv2d_nhwc(outRup_3, last_w, last_b)
        LI = conv2d_nhwc(outIup_3, last_w, last_b)
        lR_R, lI_R = jnp.split(LR, 2, axis=-1)
        lR_I, lI_I = jnp.split(LI, 2, axis=-1)
        outRup_4 = lR_R - lI_I
        outIup_4 = lR_I + lI_R

        base = resize_bilinear_nhwc(x_i, 4 * h, 4 * w, align_corners=False)
        baseR = base * attcos - base * attsin
        baseI = base * attsin + base * attcos
        outs.append(jnp.concatenate([outRup_4 + baseR, outIup_4 + baseI], axis=-1))

    out = jnp.stack(outs, axis=1)                 # (b, n, 4h, 4w, 6)
    return jnp.transpose(out, (0, 1, 4, 2, 3))    # (b, n, 6, 4h, 4w)


if __name__ == "__main__":
    key = jax.random.PRNGKey(0)
    k_param, k_x, k_phase = jax.random.split(key, 3)

    # SpyNet's fixed 5-level pyramid requires LR spatial >= 33 (rounded to 64).
    num_feat, num_block = 16, 2
    b, n, c, h, w = 1, 2, 3, 64, 64

    params = init_cvsr3_params(k_param, num_feat=num_feat, num_block=num_block)
    x = jax.random.uniform(k_x, (b, n, c, h, w), jnp.float32)
    phase_rot = jax.random.uniform(k_phase, (b, 1, 1, 1), jnp.float32) * (2.0 * math.pi)

    out = cvsr3_forward(params, x, phase_rot)
    out = jax.block_until_ready(out)
    assert out.shape == (b, n, 6, 4 * h, 4 * w), out.shape
    assert bool(jnp.isfinite(out).all())
    print("KERNEL_OK")
</pallas_src>

<mosaic_0001>
module attributes {stable_mosaic.version = 11 : i64} {
  func.func @_conv_kernel(%arg0: i32, %arg1: i32, %arg2: memref<1x8x8x8xf32, #tpu.memory_space<any>>, %arg3: memref<7x56x32xf32, #tpu.memory_space<vmem>>, %arg4: memref<1x32xf32, #tpu.memory_space<vmem>>, %arg5: memref<1x2x2x32xf32, #tpu.memory_space<vmem>>, %arg6: memref<2x8x8x8xf32, #tpu.memory_space<vmem>>, %arg7: memref<2x!tpu.dma_semaphore, #tpu.memory_space<semaphore_mem>>) attributes {dimension_semantics = [#tpu.dimension_semantics<parallel>, #tpu.dimension_semantics<arbitrary>], iteration_bounds = array<i64: 1, 1>, scalar_prefetch = 0 : i64, scratch_operands = 2 : i64, tpu.core_type = #tpu.core_type<tc>, window_params = [{}, {pipeline_mode = #tpu.pipeline_mode<synchronous>, transform_indices = @transform_1, window_bounds = array<i64: 7, 56, 32>}, {pipeline_mode = #tpu.pipeline_mode<synchronous>, transform_indices = @transform_2, window_bounds = array<i64: 1, 32>}, {transform_indices = @transform_3, window_bounds = array<i64: 1, 2, 2, 32>}]} {
    %c2_i32 = arith.constant 2 : i32
    %c0_i32 = arith.constant 0 : i32
    %0 = arith.cmpi eq, %c2_i32, %c0_i32 : i32
    %c1_i32 = arith.constant 1 : i32
    %1 = arith.select %0, %c1_i32, %c2_i32 : i32
    %2 = arith.remsi %arg1, %1 : i32
    %c0_i32_0 = arith.constant 0 : i32
    %3 = arith.cmpi ne, %2, %c0_i32_0 : i32
    %c0_i32_1 = arith.constant 0 : i32
    %4 = arith.cmpi slt, %2, %c0_i32_1 : i32
    %c0_i32_2 = arith.constant 0 : i32
    %5 = arith.cmpi slt, %1, %c0_i32_2 : i32
    %6 = arith.xori %4, %5 : i1
    %7 = arith.andi %6, %3 : i1
    %8 = arith.addi %2, %1 : i32
    %9 = arith.select %7, %8, %2 : i32
    %c0_i32_3 = arith.constant 0 : i32
    %10 = arith.cmpi eq, %arg1, %c0_i32_3 : i32
    %11 = arith.extui %10 : i1 to i32
    %c0_i32_4 = arith.constant 0 : i32
    %12 = arith.cmpi ne, %11, %c0_i32_4 : i32
    scf.if %12 {
      %c0_i32_189 = arith.constant 0 : i32
      %c0_i32_190 = arith.constant 0 : i32
      %c0_i32_191 = arith.constant 0 : i32
      %c0_i32_192 = arith.constant 0 : i32
      %c0_i32_193 = arith.constant 0 : i32
      %221 = tpu.memref_slice %arg2[%arg0, %c0_i32_191, %c0_i32_192, %c0_i32_193] : memref<1x8x8x8xf32, #tpu.memory_space<any>> -> memref<1x8x8x8xf32, #tpu.memory_space<any>>
      %222 = tpu.memref_squeeze %221 : memref<1x8x8x8xf32, #tpu.memory_space<any>> -> memref<8x8x8xf32, #tpu.memory_space<any>>
      %c0_i32_194 = arith.constant 0 : i32
      %c0_i32_195 = arith.constant 0 : i32
      %c0_i32_196 = arith.constant 0 : i32
      %223 = tpu.memref_slice %arg6[%c0_i32_189, %c0_i32_194, %c0_i32_195, %c0_i32_196] : memref<2x8x8x8xf32, #tpu.memory_space<vmem>> -> memref<1x8x8x8xf32, #tpu.memory_space<vmem>>
      %224 = tpu.memref_squeeze %223 : memref<1x8x8x8xf32, #tpu.memory_space<vmem>> -> memref<8x8x8xf32, #tpu.memory_space<vmem>>
      %225 = tpu.memref_slice %arg7[%c0_i32_190] : memref<2x!tpu.dma_semaphore, #tpu.memory_space<semaphore_mem>> -> memref<1x!tpu.dma_semaphore, #tpu.memory_space<semaphore_mem>>
      %226 = tpu.memref_squeeze %225 : memref<1x!tpu.dma_semaphore, #tpu.memory_space<semaphore_mem>> -> memref<!tpu.dma_semaphore, #tpu.memory_space<semaphore_mem>>
      tpu.enqueue_dma source(%222 : memref<8x8x8xf32, #tpu.memory_space<any>>) target(%224 : memref<8x8x8xf32, #tpu.memory_space<vmem>>) target_semaphore(%226 : memref<!tpu.dma_semaphore, #tpu.memory_space<semaphore_mem>>)
    } else {
    }
    %c1_i32_5 = arith.constant 1 : i32
    %13 = arith.addi %arg1, %c1_i32_5 : i32
    %c1_i32_6 = arith.constant 1 : i32
    %14 = arith.cmpi slt, %13, %c1_i32_6 : i32
    %15 = arith.extui %14 : i1 to i32
    %c0_i32_7 = arith.constant 0 : i32
    %16 = arith.cmpi ne, %15, %c0_i32_7 : i32
    scf.if %16 {
      %c1_i32_189 = arith.constant 1 : i32
      %221 = arith.addi %arg1, %c1_i32_189 : i32
      %c1_i32_190 = arith.constant 1 : i32
      %222 = arith.subi %c1_i32_190, %9 : i32
      %c2_i32_191 = arith.constant 2 : i32
      %223 = arith.muli %221, %c2_i32_191 : i32
      %c0_i32_192 = arith.constant 0 : i32
      %c0_i32_193 = arith.constant 0 : i32
      %224 = tpu.memref_slice %arg2[%arg0, %223, %c0_i32_192, %c0_i32_193] : memref<1x8x8x8xf32, #tpu.memory_space<any>> -> memref<1x8x8x8xf32, #tpu.memory_space<any>>
      %225 = tpu.memref_squeeze %224 : memref<1x8x8x8xf32, #tpu.memory_space<any>> -> memref<8x8x8xf32, #tpu.memory_space<any>>
      %c0_i32_194 = arith.constant 0 : i32
      %c0_i32_195 = arith.constant 0 : i32
      %c0_i32_196 = arith.constant 0 : i32
      %226 = tpu.memref_slice %arg6[%222, %c0_i32_194, %c0_i32_195, %c0_i32_196] : memref<2x8x8x8xf32, #tpu.memory_space<vmem>> -> memref<1x8x8x8xf32, #tpu.memory_space<vmem>>
      %227 = tpu.memref_squeeze %226 : memref<1x8x8x8xf32, #tpu.memory_space<vmem>> -> memref<8x8x8xf32, #tpu.memory_space<vmem>>
      %228 = tpu.memref_slice %arg7[%222] : memref<2x!tpu.dma_semaphore, #tpu.memory_space<semaphore_mem>> -> memref<1x!tpu.dma_semaphore, #tpu.memory_space<semaphore_mem>>
      %229 = tpu.memref_squeeze %228 : memref<1x!tpu.dma_semaphore, #tpu.memory_space<semaphore_mem>> -> memref<!tpu.dma_semaphore, #tpu.memory_space<semaphore_mem>>
      tpu.enqueue_dma source(%225 : memref<8x8x8xf32, #tpu.memory_space<any>>) target(%227 : memref<8x8x8xf32, #tpu.memory_space<vmem>>) target_semaphore(%229 : memref<!tpu.dma_semaphore, #tpu.memory_space<semaphore_mem>>)
    } else {
    }
    %c2_i32_8 = arith.constant 2 : i32
    %17 = arith.muli %arg1, %c2_i32_8 : i32
    %c0_i32_9 = arith.constant 0 : i32
    %c0_i32_10 = arith.constant 0 : i32
    %18 = tpu.memref_slice %arg2[%arg0, %17, %c0_i32_9, %c0_i32_10] : memref<1x8x8x8xf32, #tpu.memory_space<any>> -> memref<1x8x8x8xf32, #tpu.memory_space<any>>
    %19 = tpu.memref_squeeze %18 : memref<1x8x8x8xf32, #tpu.memory_space<any>> -> memref<8x8x8xf32, #tpu.memory_space<any>>
    %c0_i32_11 = arith.constant 0 : i32
    %c0_i32_12 = arith.constant 0 : i32
    %c0_i32_13 = arith.constant 0 : i32
    %20 = tpu.memref_slice %arg6[%9, %c0_i32_11, %c0_i32_12, %c0_i32_13] : memref<2x8x8x8xf32, #tpu.memory_space<vmem>> -> memref<1x8x8x8xf32, #tpu.memory_space<vmem>>
    %21 = tpu.memref_squeeze %20 : memref<1x8x8x8xf32, #tpu.memory_space<vmem>> -> memref<8x8x8xf32, #tpu.memory_space<vmem>>
    %22 = tpu.memref_slice %arg7[%9] : memref<2x!tpu.dma_semaphore, #tpu.memory_space<semaphore_mem>> -> memref<1x!tpu.dma_semaphore, #tpu.memory_space<semaphore_mem>>
    %23 = tpu.memref_squeeze %22 : memref<1x!tpu.dma_semaphore, #tpu.memory_space<semaphore_mem>> -> memref<!tpu.dma_semaphore, #tpu.memory_space<semaphore_mem>>
    tpu.wait_dma2 semaphore(%23 : memref<!tpu.dma_semaphore, #tpu.memory_space<semaphore_mem>>) src(%19 : memref<8x8x8xf32, #tpu.memory_space<any>>) dst(%21 : memref<8x8x8xf32, #tpu.memory_space<vmem>>)
    %cst = arith.constant 0.000000e+00 : f32
    %24 = vector.broadcast %cst : f32 to vector<4x32xf32>
    %25 = arith.index_cast %9 : i32 to index
    %c0 = arith.constant 0 : index
    %c0_14 = arith.constant 0 : index
    %c0_15 = arith.constant 0 : index
    %26 = vector.load %arg6[%25, %c0, %c0_14, %c0_15] : memref<2x8x8x8xf32, #tpu.memory_space<vmem>>, vector<1x2x2x8xf32>
    %27 = vector.shape_cast %26 : vector<1x2x2x8xf32> to vector<2x2x8xf32>
    %28 = arith.index_cast %9 : i32 to index
    %c0_16 = arith.constant 0 : index
    %c1 = arith.constant 1 : index
    %c0_17 = arith.constant 0 : index
    %29 = vector.load %arg6[%28, %c0_16, %c1, %c0_17] : memref<2x8x8x8xf32, #tpu.memory_space<vmem>>, vector<1x2x2x8xf32>
    %30 = vector.shape_cast %29 : vector<1x2x2x8xf32> to vector<2x2x8xf32>
    %31 = arith.index_cast %9 : i32 to index
    %c0_18 = arith.constant 0 : index
    %c2 = arith.constant 2 : index
    %c0_19 = arith.constant 0 : index
    %32 = vector.load %arg6[%31, %c0_18, %c2, %c0_19] : memref<2x8x8x8xf32, #tpu.memory_space<vmem>>, vector<1x2x2x8xf32>
    %33 = vector.shape_cast %32 : vector<1x2x2x8xf32> to vector<2x2x8xf32>
    %34 = arith.index_cast %9 : i32 to index
    %c0_20 = arith.constant 0 : index
    %c3 = arith.constant 3 : index
    %c0_21 = arith.constant 0 : index
    %35 = vector.load %arg6[%34, %c0_20, %c3, %c0_21] : memref<2x8x8x8xf32, #tpu.memory_space<vmem>>, vector<1x2x2x8xf32>
    %36 = vector.shape_cast %35 : vector<1x2x2x8xf32> to vector<2x2x8xf32>
    %37 = arith.index_cast %9 : i32 to index
    %c0_22 = arith.constant 0 : index
    %c4 = arith.constant 4 : index
    %c0_23 = arith.constant 0 : index
    %38 = vector.load %arg6[%37, %c0_22, %c4, %c0_23] : memref<2x8x8x8xf32, #tpu.memory_space<vmem>>, vector<1x2x2x8xf32>
    %39 = vector.shape_cast %38 : vector<1x2x2x8xf32> to vector<2x2x8xf32>
    %40 = arith.index_cast %9 : i32 to index
    %c0_24 = arith.constant 0 : index
    %c5 = arith.constant 5 : index
    %c0_25 = arith.constant 0 : index
    %41 = vector.load %arg6[%40, %c0_24, %c5, %c0_25] : memref<2x8x8x8xf32, #tpu.memory_space<vmem>>, vector<1x2x2x8xf32>
    %42 = vector.shape_cast %41 : vector<1x2x2x8xf32> to vector<2x2x8xf32>
    %43 = arith.index_cast %9 : i32 to index
    %c0_26 = arith.constant 0 : index
    %c6 = arith.constant 6 : index
    %c0_27 = arith.constant 0 : index
    %44 = vector.load %arg6[%43, %c0_26, %c6, %c0_27] : memref<2x8x8x8xf32, #tpu.memory_space<vmem>>, vector<1x2x2x8xf32>
    %45 = vector.shape_cast %44 : vector<1x2x2x8xf32> to vector<2x2x8xf32>
    %46 = tpu.concatenate %27, %30, %33, %36, %39, %42, %45 in 2 : vector<2x2x8xf32>, vector<2x2x8xf32>, vector<2x2x8xf32>, vector<2x2x8xf32>, vector<2x2x8xf32>, vector<2x2x8xf32>, vector<2x2x8xf32> -> vector<2x2x56xf32>
    %47 = vector.shape_cast %46 : vector<2x2x56xf32> to vector<4x56xf32>
    %c0_28 = arith.constant 0 : index
    %c0_29 = arith.constant 0 : index
    %c0_30 = arith.constant 0 : index
    %48 = vector.load %arg3[%c0_28, %c0_29, %c0_30] : memref<7x56x32xf32, #tpu.memory_space<vmem>>, vector<1x56x32xf32>
    %49 = vector.shape_cast %48 : vector<1x56x32xf32> to vector<56x32xf32>
    %cst_31 = arith.constant dense<0.000000e+00> : vector<4x32xf32>
    %50 = tpu.matmul %47, %49, %cst_31 {dimension_numbers = #tpu.dot_dimension_numbers<[1], [0], [0], [1], [0, 0, 1, 1], [], []>} : vector<4x56xf32>, vector<56x32xf32>, vector<4x32xf32> -> vector<4x32xf32>
    %51 = arith.addf %24, %50 : vector<4x32xf32>
    %52 = arith.index_cast %9 : i32 to index
    %c1_32 = arith.constant 1 : index
    %c0_33 = arith.constant 0 : index
    %c0_34 = arith.constant 0 : index
    %53 = vector.load %arg6[%52, %c1_32, %c0_33, %c0_34] : memref<2x8x8x8xf32, #tpu.memory_space<vmem>>, vector<1x2x2x8xf32>
    %54 = vector.shape_cast %53 : vector<1x2x2x8xf32> to vector<2x2x8xf32>
    %55 = arith.index_cast %9 : i32 to index
    %c1_35 = arith.constant 1 : index
    %c1_36 = arith.constant 1 : index
    %c0_37 = arith.constant 0 : index
    %56 = vector.load %arg6[%55, %c1_35, %c1_36, %c0_37] : memref<2x8x8x8xf32, #tpu.memory_space<vmem>>, vector<1x2x2x8xf32>
    %57 = vector.shape_cast %56 : vector<1x2x2x8xf32> to vector<2x2x8xf32>
    %58 = arith.index_cast %9 : i32 to index
    %c1_38 = arith.constant 1 : index
    %c2_39 = arith.constant 2 : index
    %c0_40 = arith.constant 0 : index
    %59 = vector.load %arg6[%58, %c1_38, %c2_39, %c0_40] : memref<2x8x8x8xf32, #tpu.memory_space<vmem>>, vector<1x2x2x8xf32>
    %60 = vector.shape_cast %59 : vector<1x2x2x8xf32> to vector<2x2x8xf32>
    %61 = arith.index_cast %9 : i32 to index
    %c1_41 = arith.constant 1 : index
    %c3_42 = arith.constant 3 : index
    %c0_43 = arith.constant 0 : index
    %62 = vector.load %arg6[%61, %c1_41, %c3_42, %c0_43] : memref<2x8x8x8xf32, #tpu.memory_space<vmem>>, vector<1x2x2x8xf32>
    %63 = vector.shape_cast %62 : vector<1x2x2x8xf32> to vector<2x2x8xf32>
    %64 = arith.index_cast %9 : i32 to index
    %c1_44 = arith.constant 1 : index
    %c4_45 = arith.constant 4 : index
    %c0_46 = arith.constant 0 : index
    %65 = vector.load %arg6[%64, %c1_44, %c4_45, %c0_46] : memref<2x8x8x8xf32, #tpu.memory_space<vmem>>, vector<1x2x2x8xf32>
    %66 = vector.shape_cast %65 : vector<1x2x2x8xf32> to vector<2x2x8xf32>
    %67 = arith.index_cast %9 : i32 to index
    %c1_47 = arith.constant 1 : index
    %c5_48 = arith.constant 5 : index
    %c0_49 = arith.constant 0 : index
    %68 = vector.load %arg6[%67, %c1_47, %c5_48, %c0_49] : memref<2x8x8x8xf32, #tpu.memory_space<vmem>>, vector<1x2x2x8xf32>
    %69 = vector.shape_cast %68 : vector<1x2x2x8xf32> to vector<2x2x8xf32>
    %70 = arith.index_cast %9 : i32 to index
    %c1_50 = arith.constant 1 : index
    %c6_51 = arith.constant 6 : index
    %c0_52 = arith.constant 0 : index
    %71 = vector.load %arg6[%70, %c1_50, %c6_51, %c0_52] : memref<2x8x8x8xf32, #tpu.memory_space<vmem>>, vector<1x2x2x8xf32>
    %72 = vector.shape_cast %71 : vector<1x2x2x8xf32> to vector<2x2x8xf32>
    %73 = tpu.concatenate %54, %57, %60, %63, %66, %69, %72 in 2 : vector<2x2x8xf32>, vector<2x2x8xf32>, vector<2x2x8xf32>, vector<2x2x8xf32>, vector<2x2x8xf32>, vector<2x2x8xf32>, vector<2x2x8xf32> -> vector<2x2x56xf32>
    %74 = vector.shape_cast %73 : vector<2x2x56xf32> to vector<4x56xf32>
    %c1_53 = arith.constant 1 : index
    %c0_54 = arith.constant 0 : index
    %c0_55 = arith.constant 0 : index
    %75 = vector.load %arg3[%c1_53, %c0_54, %c0_55] : memref<7x56x32xf32, #tpu.memory_space<vmem>>, vector<1x56x32xf32>
    %76 = vector.shape_cast %75 : vector<1x56x32xf32> to vector<56x32xf32>
    %cst_56 = arith.constant dense<0.000000e+00> : vector<4x32xf32>
    %77 = tpu.matmul %74, %76, %cst_56 {dimension_numbers = #tpu.dot_dimension_numbers<[1], [0], [0], [1], [0, 0, 1, 1], [], []>} : vector<4x56xf32>, vector<56x32xf32>, vector<4x32xf32> -> vector<4x32xf32>
    %78 = arith.addf %51, %77 : vector<4x32xf32>
    %79 = arith.index_cast %9 : i32 to index
    %c2_57 = arith.constant 2 : index
    %c0_58 = arith.constant 0 : index
    %c0_59 = arith.constant 0 : index
    %80 = vector.load %arg6[%79, %c2_57, %c0_58, %c0_59] : memref<2x8x8x8xf32, #tpu.memory_space<vmem>>, vector<1x2x2x8xf32>
    %81 = vector.shape_cast %80 : vector<1x2x2x8xf32> to vector<2x2x8xf32>
    %82 = arith.index_cast %9 : i32 to index
    %c2_60 = arith.constant 2 : index
    %c1_61 = arith.constant 1 : index
    %c0_62 = arith.constant 0 : index
    %83 = vector.load %arg6[%82, %c2_60, %c1_61, %c0_62] : memref<2x8x8x8xf32, #tpu.memory_space<vmem>>, vector<1x2x2x8xf32>
    %84 = vector.shape_cast %83 : vector<1x2x2x8xf32> to vector<2x2x8xf32>
    %85 = arith.index_cast %9 : i32 to index
    %c2_63 = arith.constant 2 : index
    %c2_64 = arith.constant 2 : index
    %c0_65 = arith.constant 0 : index
    %86 = vector.load %arg6[%85, %c2_63, %c2_64, %c0_65] : memref<2x8x8x8xf32, #tpu.memory_space<vmem>>, vector<1x2x2x8xf32>
    %87 = vector.shape_cast %86 : vector<1x2x2x8xf32> to vector<2x2x8xf32>
    %88 = arith.index_cast %9 : i32 to index
    %c2_66 = arith.constant 2 : index
    %c3_67 = arith.constant 3 : index
    %c0_68 = arith.constant 0 : index
    %89 = vector.load %arg6[%88, %c2_66, %c3_67, %c0_68] : memref<2x8x8x8xf32, #tpu.memory_space<vmem>>, vector<1x2x2x8xf32>
    %90 = vector.shape_cast %89 : vector<1x2x2x8xf32> to vector<2x2x8xf32>
    %91 = arith.index_cast %9 : i32 to index
    %c2_69 = arith.constant 2 : index
    %c4_70 = arith.constant 4 : index
    %c0_71 = arith.constant 0 : index
    %92 = vector.load %arg6[%91, %c2_69, %c4_70, %c0_71] : memref<2x8x8x8xf32, #tpu.memory_space<vmem>>, vector<1x2x2x8xf32>
    %93 = vector.shape_cast %92 : vector<1x2x2x8xf32> to vector<2x2x8xf32>
    %94 = arith.index_cast %9 : i32 to index
    %c2_72 = arith.constant 2 : index
    %c5_73 = arith.constant 5 : index
    %c0_74 = arith.constant 0 : index
    %95 = vector.load %arg6[%94, %c2_72, %c5_73, %c0_74] : memref<2x8x8x8xf32, #tpu.memory_space<vmem>>, vector<1x2x2x8xf32>
    %96 = vector.shape_cast %95 : vector<1x2x2x8xf32> to vector<2x2x8xf32>
    %97 = arith.index_cast %9 : i32 to index
    %c2_75 = arith.constant 2 : index
    %c6_76 = arith.constant 6 : index
    %c0_77 = arith.constant 0 : index
    %98 = vector.load %arg6[%97, %c2_75, %c6_76, %c0_77] : memref<2x8x8x8xf32, #tpu.memory_space<vmem>>, vector<1x2x2x8xf32>
    %99 = vector.shape_cast %98 : vector<1x2x2x8xf32> to vector<2x2x8xf32>
    %100 = tpu.concatenate %81, %84, %87, %90, %93, %96, %99 in 2 : vector<2x2x8xf32>, vector<2x2x8xf32>, vector<2x2x8xf32>, vector<2x2x8xf32>, vector<2x2x8xf32>, vector<2x2x8xf32>, vector<2x2x8xf32> -> vector<2x2x56xf32>
    %101 = vector.shape_cast %100 : vector<2x2x56xf32> to vector<4x56xf32>
    %c2_78 = arith.constant 2 : index
    %c0_79 = arith.constant 0 : index
    %c0_80 = arith.constant 0 : index
    %102 = vector.load %arg3[%c2_78, %c0_79, %c0_80] : memref<7x56x32xf32, #tpu.memory_space<vmem>>, vector<1x56x32xf32>
    %103 = vector.shape_cast %102 : vector<1x56x32xf32> to vector<56x32xf32>
    %cst_81 = arith.constant dense<0.000000e+00> : vector<4x32xf32>
    %104 = tpu.matmul %101, %103, %cst_81 {dimension_numbers = #tpu.dot_dimension_numbers<[1], [0], [0], [1], [0, 0, 1, 1], [], []>} : vector<4x56xf32>, vector<56x32xf32>, vector<4x32xf32> -> vector<4x32xf32>
    %105 = arith.addf %78, %104 : vector<4x32xf32>
    %106 = arith.index_cast %9 : i32 to index
    %c3_82 = arith.constant 3 : index
    %c0_83 = arith.constant 0 : index
    %c0_84 = arith.constant 0 : index
    %107 = vector.load %arg6[%106, %c3_82, %c0_83, %c0_84] : memref<2x8x8x8xf32, #tpu.memory_space<vmem>>, vector<1x2x2x8xf32>
    %108 = vector.shape_cast %107 : vector<1x2x2x8xf32> to vector<2x2x8xf32>
    %109 = arith.index_cast %9 : i32 to index
    %c3_85 = arith.constant 3 : index
    %c1_86 = arith.constant 1 : index
    %c0_87 = arith.constant 0 : index
    %110 = vector.load %arg6[%109, %c3_85, %c1_86, %c0_87] : memref<2x8x8x8xf32, #tpu.memory_space<vmem>>, vector<1x2x2x8xf32>
    %111 = vector.shape_cast %110 : vector<1x2x2x8xf32> to vector<2x2x8xf32>
    %112 = arith.index_cast %9 : i32 to index
    %c3_88 = arith.constant 3 : index
    %c2_89 = arith.constant 2 : index
    %c0_90 = arith.constant 0 : index
    %113 = vector.load %arg6[%112, %c3_88, %c2_89, %c0_90] : memref<2x8x8x8xf32, #tpu.memory_space<vmem>>, vector<1x2x2x8xf32>
    %114 = vector.shape_cast %113 : vector<1x2x2x8xf32> to vector<2x2x8xf32>
    %115 = arith.index_cast %9 : i32 to index
    %c3_91 = arith.constant 3 : index
    %c3_92 = arith.constant 3 : index
    %c0_93 = arith.constant 0 : index
    %116 = vector.load %arg6[%115, %c3_91, %c3_92, %c0_93] : memref<2x8x8x8xf32, #tpu.memory_space<vmem>>, vector<1x2x2x8xf32>
    %117 = vector.shape_cast %116 : vector<1x2x2x8xf32> to vector<2x2x8xf32>
    %118 = arith.index_cast %9 : i32 to index
    %c3_94 = arith.constant 3 : index
    %c4_95 = arith.constant 4 : index
    %c0_96 = arith.constant 0 : index
    %119 = vector.load %arg6[%118, %c3_94, %c4_95, %c0_96] : memref<2x8x8x8xf32, #tpu.memory_space<vmem>>, vector<1x2x2x8xf32>
    %120 = vector.shape_cast %119 : vector<1x2x2x8xf32> to vector<2x2x8xf32>
    %121 = arith.index_cast %9 : i32 to index
    %c3_97 = arith.constant 3 : index
    %c5_98 = arith.constant 5 : index
    %c0_99 = arith.constant 0 : index
    %122 = vector.load %arg6[%121, %c3_97, %c5_98, %c0_99] : memref<2x8x8x8xf32, #tpu.memory_space<vmem>>, vector<1x2x2x8xf32>
    %123 = vector.shape_cast %122 : vector<1x2x2x8xf32> to vector<2x2x8xf32>
    %124 = arith.index_cast %9 : i32 to index
    %c3_100 = arith.constant 3 : index
    %c6_101 = arith.constant 6 : index
    %c0_102 = arith.constant 0 : index
    %125 = vector.load %arg6[%124, %c3_100, %c6_101, %c0_102] : memref<2x8x8x8xf32, #tpu.memory_space<vmem>>, vector<1x2x2x8xf32>
    %126 = vector.shape_cast %125 : vector<1x2x2x8xf32> to vector<2x2x8xf32>
    %127 = tpu.concatenate %108, %111, %114, %117, %120, %123, %126 in 2 : vector<2x2x8xf32>, vector<2x2x8xf32>, vector<2x2x8xf32>, vector<2x2x8xf32>, vector<2x2x8xf32>, vector<2x2x8xf32>, vector<2x2x8xf32> -> vector<2x2x56xf32>
    %128 = vector.shape_cast %127 : vector<2x2x56xf32> to vector<4x56xf32>
    %c3_103 = arith.constant 3 : index
    %c0_104 = arith.constant 0 : index
    %c0_105 = arith.constant 0 : index
    %129 = vector.load %arg3[%c3_103, %c0_104, %c0_105] : memref<7x56x32xf32, #tpu.memory_space<vmem>>, vector<1x56x32xf32>
    %130 = vector.shape_cast %129 : vector<1x56x32xf32> to vector<56x32xf32>
    %cst_106 = arith.constant dense<0.000000e+00> : vector<4x32xf32>
    %131 = tpu.matmul %128, %130, %cst_106 {dimension_numbers = #tpu.dot_dimension_numbers<[1], [0], [0], [1], [0, 0, 1, 1], [], []>} : vector<4x56xf32>, vector<56x32xf32>, vector<4x32xf32> -> vector<4x32xf32>
    %132 = arith.addf %105, %131 : vector<4x32xf32>
    %133 = arith.index_cast %9 : i32 to index
    %c4_107 = arith.constant 4 : index
    %c0_108 = arith.constant 0 : index
    %c0_109 = arith.constant 0 : index
    %134 = vector.load %arg6[%133, %c4_107, %c0_108, %c0_109] : memref<2x8x8x8xf32, #tpu.memory_space<vmem>>, vector<1x2x2x8xf32>
    %135 = vector.shape_cast %134 : vector<1x2x2x8xf32> to vector<2x2x8xf32>
    %136 = arith.index_cast %9 : i32 to index
    %c4_110 = arith.constant 4 : index
    %c1_111 = arith.constant 1 : index
    %c0_112 = arith.constant 0 : index
    %137 = vector.load %arg6[%136, %c4_110, %c1_111, %c0_112] : memref<2x8x8x8xf32, #tpu.memory_space<vmem>>, vector<1x2x2x8xf32>
    %138 = vector.shape_cast %137 : vector<1x2x2x8xf32> to vector<2x2x8xf32>
    %139 = arith.index_cast %9 : i32 to index
    %c4_113 = arith.constant 4 : index
    %c2_114 = arith.constant 2 : index
    %c0_115 = arith.constant 0 : index
    %140 = vector.load %arg6[%139, %c4_113, %c2_114, %c0_115] : memref<2x8x8x8xf32, #tpu.memory_space<vmem>>, vector<1x2x2x8xf32>
    %141 = vector.shape_cast %140 : vector<1x2x2x8xf32> to vector<2x2x8xf32>
    %142 = arith.index_cast %9 : i32 to index
    %c4_116 = arith.constant 4 : index
    %c3_117 = arith.constant 3 : index
    %c0_118 = arith.constant 0 : index
    %143 = vector.load %arg6[%142, %c4_116, %c3_117, %c0_118] : memref<2x8x8x8xf32, #tpu.memory_space<vmem>>, vector<1x2x2x8xf32>
    %144 = vector.shape_cast %143 : vector<1x2x2x8xf32> to vector<2x2x8xf32>
    %145 = arith.index_cast %9 : i32 to index
    %c4_119 = arith.constant 4 : index
    %c4_120 = arith.constant 4 : index
    %c0_121 = arith.constant 0 : index
    %146 = vector.load %arg6[%145, %c4_119, %c4_120, %c0_121] : memref<2x8x8x8xf32, #tpu.memory_space<vmem>>, vector<1x2x2x8xf32>
    %147 = vector.shape_cast %146 : vector<1x2x2x8xf32> to vector<2x2x8xf32>
    %148 = arith.index_cast %9 : i32 to index
    %c4_122 = arith.constant 4 : index
    %c5_123 = arith.constant 5 : index
    %c0_124 = arith.constant 0 : index
    %149 = vector.load %arg6[%148, %c4_122, %c5_123, %c0_124] : memref<2x8x8x8xf32, #tpu.memory_space<vmem>>, vector<1x2x2x8xf32>
    %150 = vector.shape_cast %149 : vector<1x2x2x8xf32> to vector<2x2x8xf32>
    %151 = arith.index_cast %9 : i32 to index
    %c4_125 = arith.constant 4 : index
    %c6_126 = arith.constant 6 : index
    %c0_127 = arith.constant 0 : index
    %152 = vector.load %arg6[%151, %c4_125, %c6_126, %c0_127] : memref<2x8x8x8xf32, #tpu.memory_space<vmem>>, vector<1x2x2x8xf32>
    %153 = vector.shape_cast %152 : vector<1x2x2x8xf32> to vector<2x2x8xf32>
    %154 = tpu.concatenate %135, %138, %141, %144, %147, %150, %153 in 2 : vector<2x2x8xf32>, vector<2x2x8xf32>, vector<2x2x8xf32>, vector<2x2x8xf32>, vector<2x2x8xf32>, vector<2x2x8xf32>, vector<2x2x8xf32> -> vector<2x2x56xf32>
    %155 = vector.shape_cast %154 : vector<2x2x56xf32> to vector<4x56xf32>
    %c4_128 = arith.constant 4 : index
    %c0_129 = arith.constant 0 : index
    %c0_130 = arith.constant 0 : index
    %156 = vector.load %arg3[%c4_128, %c0_129, %c0_130] : memref<7x56x32xf32, #tpu.memory_space<vmem>>, vector<1x56x32xf32>
    %157 = vector.shape_cast %156 : vector<1x56x32xf32> to vector<56x32xf32>
    %cst_131 = arith.constant dense<0.000000e+00> : vector<4x32xf32>
    %158 = tpu.matmul %155, %157, %cst_131 {dimension_numbers = #tpu.dot_dimension_numbers<[1], [0], [0], [1], [0, 0, 1, 1], [], []>} : vector<4x56xf32>, vector<56x32xf32>, vector<4x32xf32> -> vector<4x32xf32>
    %159 = arith.addf %132, %158 : vector<4x32xf32>
    %160 = arith.index_cast %9 : i32 to index
    %c5_132 = arith.constant 5 : index
    %c0_133 = arith.constant 0 : index
    %c0_134 = arith.constant 0 : index
    %161 = vector.load %arg6[%160, %c5_132, %c0_133, %c0_134] : memref<2x8x8x8xf32, #tpu.memory_space<vmem>>, vector<1x2x2x8xf32>
    %162 = vector.shape_cast %161 : vector<1x2x2x8xf32> to vector<2x2x8xf32>
    %163 = arith.index_cast %9 : i32 to index
    %c5_135 = arith.constant 5 : index
    %c1_136 = arith.constant 1 : index
    %c0_137 = arith.constant 0 : index
    %164 = vector.load %arg6[%163, %c5_135, %c1_136, %c0_137] : memref<2x8x8x8xf32, #tpu.memory_space<vmem>>, vector<1x2x2x8xf32>
    %165 = vector.shape_cast %164 : vector<1x2x2x8xf32> to vector<2x2x8xf32>
    %166 = arith.index_cast %9 : i32 to index
    %c5_138 = arith.constant 5 : index
    %c2_139 = arith.constant 2 : index
    %c0_140 = arith.constant 0 : index
    %167 = vector.load %arg6[%166, %c5_138, %c2_139, %c0_140] : memref<2x8x8x8xf32, #tpu.memory_space<vmem>>, vector<1x2x2x8xf32>
    %168 = vector.shape_cast %167 : vector<1x2x2x8xf32> to vector<2x2x8xf32>
    %169 = arith.index_cast %9 : i32 to index
    %c5_141 = arith.constant 5 : index
    %c3_142 = arith.constant 3 : index
    %c0_143 = arith.constant 0 : index
    %170 = vector.load %arg6[%169, %c5_141, %c3_142, %c0_143] : memref<2x8x8x8xf32, #tpu.memory_space<vmem>>, vector<1x2x2x8xf32>
    %171 = vector.shape_cast %170 : vector<1x2x2x8xf32> to vector<2x2x8xf32>
    %172 = arith.index_cast %9 : i32 to index
    %c5_144 = arith.constant 5 : index
    %c4_145 = arith.constant 4 : index
    %c0_146 = arith.constant 0 : index
    %173 = vector.load %arg6[%172, %c5_144, %c4_145, %c0_146] : memref<2x8x8x8xf32, #tpu.memory_space<vmem>>, vector<1x2x2x8xf32>
    %174 = vector.shape_cast %173 : vector<1x2x2x8xf32> to vector<2x2x8xf32>
    %175 = arith.index_cast %9 : i32 to index
    %c5_147 = arith.constant 5 : index
    %c5_148 = arith.constant 5 : index
    %c0_149 = arith.constant 0 : index
    %176 = vector.load %arg6[%175, %c5_147, %c5_148, %c0_149] : memref<2x8x8x8xf32, #tpu.memory_space<vmem>>, vector<1x2x2x8xf32>
    %177 = vector.shape_cast %176 : vector<1x2x2x8xf32> to vector<2x2x8xf32>
    %178 = arith.index_cast %9 : i32 to index
    %c5_150 = arith.constant 5 : index
    %c6_151 = arith.constant 6 : index
    %c0_152 = arith.constant 0 : index
    %179 = vector.load %arg6[%178, %c5_150, %c6_151, %c0_152] : memref<2x8x8x8xf32, #tpu.memory_space<vmem>>, vector<1x2x2x8xf32>
    %180 = vector.shape_cast %179 : vector<1x2x2x8xf32> to vector<2x2x8xf32>
    %181 = tpu.concatenate %162, %165, %168, %171, %174, %177, %180 in 2 : vector<2x2x8xf32>, vector<2x2x8xf32>, vector<2x2x8xf32>, vector<2x2x8xf32>, vector<2x2x8xf32>, vector<2x2x8xf32>, vector<2x2x8xf32> -> vector<2x2x56xf32>
    %182 = vector.shape_cast %181 : vector<2x2x56xf32> to vector<4x56xf32>
    %c5_153 = arith.constant 5 : index
    %c0_154 = arith.constant 0 : index
    %c0_155 = arith.constant 0 : index
    %183 = vector.load %arg3[%c5_153, %c0_154, %c0_155] : memref<7x56x32xf32, #tpu.memory_space<vmem>>, vector<1x56x32xf32>
    %184 = vector.shape_cast %183 : vector<1x56x32xf32> to vector<56x32xf32>
    %cst_156 = arith.constant dense<0.000000e+00> : vector<4x32xf32>
    %185 = tpu.matmul %182, %184, %cst_156 {dimension_numbers = #tpu.dot_dimension_numbers<[1], [0], [0], [1], [0, 0, 1, 1], [], []>} : vector<4x56xf32>, vector<56x32xf32>, vector<4x32xf32> -> vector<4x32xf32>
    %186 = arith.addf %159, %185 : vector<4x32xf32>
    %187 = arith.index_cast %9 : i32 to index
    %c6_157 = arith.constant 6 : index
    %c0_158 = arith.constant 0 : index
    %c0_159 = arith.constant 0 : index
    %188 = vector.load %arg6[%187, %c6_157, %c0_158, %c0_159] : memref<2x8x8x8xf32, #tpu.memory_space<vmem>>, vector<1x2x2x8xf32>
    %189 = vector.shape_cast %188 : vector<1x2x2x8xf32> to vector<2x2x8xf32>
    %190 = arith.index_cast %9 : i32 to index
    %c6_160 = arith.constant 6 : index
    %c1_161 = arith.constant 1 : index
    %c0_162 = arith.constant 0 : index
    %191 = vector.load %arg6[%190, %c6_160, %c1_161, %c0_162] : memref<2x8x8x8xf32, #tpu.memory_space<vmem>>, vector<1x2x2x8xf32>
    %192 = vector.shape_cast %191 : vector<1x2x2x8xf32> to vector<2x2x8xf32>
    %193 = arith.index_cast %9 : i32 to index
    %c6_163 = arith.constant 6 : index
    %c2_164 = arith.constant 2 : index
    %c0_165 = arith.constant 0 : index
    %194 = vector.load %arg6[%193, %c6_163, %c2_164, %c0_165] : memref<2x8x8x8xf32, #tpu.memory_space<vmem>>, vector<1x2x2x8xf32>
    %195 = vector.shape_cast %194 : vector<1x2x2x8xf32> to vector<2x2x8xf32>
    %196 = arith.index_cast %9 : i32 to index
    %c6_166 = arith.constant 6 : index
    %c3_167 = arith.constant 3 : index
    %c0_168 = arith.constant 0 : index
    %197 = vector.load %arg6[%196, %c6_166, %c3_167, %c0_168] : memref<2x8x8x8xf32, #tpu.memory_space<vmem>>, vector<1x2x2x8xf32>
    %198 = vector.shape_cast %197 : vector<1x2x2x8xf32> to vector<2x2x8xf32>
    %199 = arith.index_cast %9 : i32 to index
    %c6_169 = arith.constant 6 : index
    %c4_170 = arith.constant 4 : index
    %c0_171 = arith.constant 0 : index
    %200 = vector.load %arg6[%199, %c6_169, %c4_170, %c0_171] : memref<2x8x8x8xf32, #tpu.memory_space<vmem>>, vector<1x2x2x8xf32>
    %201 = vector.shape_cast %200 : vector<1x2x2x8xf32> to vector<2x2x8xf32>
    %202 = arith.index_cast %9 : i32 to index
    %c6_172 = arith.constant 6 : index
    %c5_173 = arith.constant 5 : index
    %c0_174 = arith.constant 0 : index
    %203 = vector.load %arg6[%202, %c6_172, %c5_173, %c0_174] : memref<2x8x8x8xf32, #tpu.memory_space<vmem>>, vector<1x2x2x8xf32>
    %204 = vector.shape_cast %203 : vector<1x2x2x8xf32> to vector<2x2x8xf32>
    %205 = arith.index_cast %9 : i32 to index
    %c6_175 = arith.constant 6 : index
    %c6_176 = arith.constant 6 : index
    %c0_177 = arith.constant 0 : index
    %206 = vector.load %arg6[%205, %c6_175, %c6_176, %c0_177] : memref<2x8x8x8xf32, #tpu.memory_space<vmem>>, vector<1x2x2x8xf32>
    %207 = vector.shape_cast %206 : vector<1x2x2x8xf32> to vector<2x2x8xf32>
    %208 = tpu.concatenate %189, %192, %195, %198, %201, %204, %207 in 2 : vector<2x2x8xf32>, vector<2x2x8xf32>, vector<2x2x8xf32>, vector<2x2x8xf32>, vector<2x2x8xf32>, vector<2x2x8xf32>, vector<2x2x8xf32> -> vector<2x2x56xf32>
    %209 = vector.shape_cast %208 : vector<2x2x56xf32> to vector<4x56xf32>
    %c6_178 = arith.constant 6 : index
    %c0_179 = arith.constant 0 : index
    %c0_180 = arith.constant 0 : index
    %210 = vector.load %arg3[%c6_178, %c0_179, %c0_180] : memref<7x56x32xf32, #tpu.memory_space<vmem>>, vector<1x56x32xf32>
    %211 = vector.shape_cast %210 : vector<1x56x32xf32> to vector<56x32xf32>
    %cst_181 = arith.constant dense<0.000000e+00> : vector<4x32xf32>
    %212 = tpu.matmul %209, %211, %cst_181 {dimension_numbers = #tpu.dot_dimension_numbers<[1], [0], [0], [1], [0, 0, 1, 1], [], []>} : vector<4x56xf32>, vector<56x32xf32>, vector<4x32xf32> -> vector<4x32xf32>
    %213 = arith.addf %186, %212 : vector<4x32xf32>
    %c0_182 = arith.constant 0 : index
    %c0_183 = arith.constant 0 : index
    %214 = vector.load %arg4[%c0_182, %c0_183] : memref<1x32xf32, #tpu.memory_space<vmem>>, vector<1x32xf32>
    %215 = vector.broadcast %214 : vector<1x32xf32> to vector<4x32xf32>
    %216 = arith.addf %213, %215 : vector<4x32xf32>
    %cst_184 = arith.constant 0.000000e+00 : f32
    %217 = vector.broadcast %cst_184 : f32 to vector<4x32xf32>
    %218 = arith.maximumf %216, %217 : vector<4x32xf32>
    %219 = vector.shape_cast %218 : vector<4x32xf32> to vector<1x2x2x32xf32>
    %c0_185 = arith.constant 0 : index
    %c0_186 = arith.constant 0 : index
    %c0_187 = arith.constant 0 : index
    %c0_188 = arith.constant 0 : index
    %220 = vector.load %arg5[%c0_185, %c0_186, %c0_187, %c0_188] : memref<1x2x2x32xf32, #tpu.memory_space<vmem>>, vector<1x2x2x32xf32>
    tpu.vector_store %arg5[%c0_185, %c0_186, %c0_187, %c0_188], %219 {strides = array<i32>} : memref<1x2x2x32xf32, #tpu.memory_space<vmem>>, vector<1x2x2x32xf32>,
    return
  }
  func.func @transform_1(%arg0: i32, %arg1: i32) -> (i32, i32, i32) {
    %c0_i32 = arith.constant 0 : i32
    %c0_i32_0 = arith.constant 0 : i32
    %c0_i32_1 = arith.constant 0 : i32
    %c0_i32_2 = arith.constant 0 : i32
    return %c0_i32, %c0_i32_0, %c0_i32_1 : i32, i32, i32
  }
  func.func @transform_2(%arg0: i32, %arg1: i32) -> (i32, i32) {
    %c0_i32 = arith.constant 0 : i32
    %c0_i32_0 = arith.constant 0 : i32
    %c0_i32_1 = arith.constant 0 : i32
    return %c0_i32, %c0_i32_0 : i32, i32
  }
  func.func @transform_3(%arg0: i32, %arg1: i32) -> (i32, i32, i32, i32) {
    %c0_i32 = arith.constant 0 : i32
    %c0_i32_0 = arith.constant 0 : i32
    %c0_i32_1 = arith.constant 0 : i32
    return %arg0, %arg1, %c0_i32, %c0_i32_0 : i32, i32, i32, i32
  }
}

</mosaic_0001>

<bundles_post_ra>
// kernel: conv2d_nhwc.1
= control target key start
LH: loop header
LB: loop body
LE: loop exit
PB: predicated region body
PF: predicated region fallthrough
CT: control target
= control target key end

     0   :  { %8 = vsyncpa [#allocation5], 0  ;;  %s2075_s0 = inlined_call_operand.vmem [shape: f32[1,8,8,8], index: 0, kind: input, shape index: {}]   ;;  %s2076_s1 = inlined_call_operand.hbm [shape: f32[7,56,32], index: 1, kind: input, shape index: {}]   ;;  %s2077_s2 = inlined_call_operand.vmem [shape: f32[1,32], index: 2, kind: input, shape index: {}]   ;;  %s2078_s3 = inlined_call_operand.hbm [shape: f32[1,2,2,32], index: 3, kind: output, shape index: {}]  }
   0x1   :  { %9 = vsyncpa [#allocation6], 0  ;;  %s1760_s12 = smov [#allocation4]   ;;  %s1710_s16 = scalar_lea.hbm %s2076_s1, 6272 }
   0x2   :  { %s15_s13 = sshll.u32 %s1760_s12, 4  ;;  %p1711_p0 = scmp.ne.s32.totalorder %s2076_s1, %s1710_s16  ;;  %s16_s13 = int_to_ptr.vmem [resolvable:$true] %s15_s13 }
   0x3   :  { %p1714_p1 = scmp.lt.u32.totalorder %s1710_s16, %s2076_s1 }
   0x5   :  { %p1716_p2 = pnand %p1714_p1, %p1711_p0 }
   0x7   :  { %1719 = shalt.err (!%p1716_p2)
}
   0x8   :  { %s1720_s21 = scalar_lea.vmem %s16_s13, 6272  ;;  %p1725_p4 = scmp.lt.s32.totalorder %s16_s13, %s16_s13 }
   0x9   :  { %p1721_p3 = scmp.ne.s32.totalorder %s16_s13, %s1720_s21  ;;  %p1726_p5 = scmp.lt.s32.totalorder %s1720_s21, %s1720_s21 }
   0xb   :  { %p1727_p6 = por %p1726_p5, %p1725_p4 }
   0xd   :  { %p1728_p7 = pnand %p1727_p6, %p1721_p3 }
   0xf   :  { %1731 = shalt.err (!%p1728_p7)
}
  0x10   :  { %s1761_s22 = smov 128   ;;  %s1762_s23 = smov 8  }
  0x11   :  { %21 = dma.hbm_to_vmem [thread:$0]  %s2076_s1, 6272, %s16_s13, [#allocation5], %s1761_s22, %s1761_s22, %s1762_s23  }
  0x12   :  { %1754 = dma.done.wait [#allocation5], 6272  }
  0x13   :  { %1755 = vsyncadd [#allocation5], 4294961024  ;;  %v73_v0 = vld [vmem:[%s2075_s0] sm:$0xff]  ;;  %v75_v1 = vld [vmem:[%s2075_s0 + $0x8] sm:$0xff] }
  0x14   :  { %v77_v2 = vld [vmem:[%s2075_s0 + $0x10] sm:$0xff]  ;;  %74 = vst [vmem:[#allocation2] sm:$0xff] %v73_v0  ;;  %76 = vst [vmem:[#allocation2 + $0x8] sm:$0xff] %v75_v1  ;;  %v79_v3 = vld [vmem:[%s2075_s0 + $0x18] sm:$0xff] }
  0x15   :  { %78 = vst [vmem:[#allocation2 + $0x10] sm:$0xff] %v77_v2  ;;  %v81_v4 = vld [vmem:[%s2075_s0 + $0x20] sm:$0xff]  ;;  %v83_v5 = vld [vmem:[%s2075_s0 + $0x28] sm:$0xff]  ;;  %80 = vst [vmem:[#allocation2 + $0x18] sm:$0xff] %v79_v3 }
  0x16   :  { %82 = vst [vmem:[#allocation2 + $0x20] sm:$0xff] %v81_v4  ;;  %84 = vst [vmem:[#allocation2 + $0x28] sm:$0xff] %v83_v5  ;;  %v85_v6 = vld [vmem:[%s2075_s0 + $0x30] sm:$0xff]  ;;  %v87_v7 = vld [vmem:[%s2075_s0 + $0x38] sm:$0xff] }
  0x17   :  { %86 = vst [vmem:[#allocation2 + $0x30] sm:$0xff] %v85_v6  ;;  %88 = vst [vmem:[#allocation2 + $0x38] sm:$0xff] %v87_v7 }
  0x18   :  { %96 = vsyncadd [#allocation3], 1024 }
  0x19   :  { %1756 = dma.done.wait [#allocation3], 1024 }
  0x1a   :  { %1757 = vsyncadd [#allocation3], 4294966272  ;;  %v1763_v8 = vmov 0.0|0.0   ;;  %s1764_s14 = smov 16   ;;  %s1765_s0 = smov 24   ;;  %v338_v23 = vld [vmem:[#allocation4 + $0x38] sm:$0xff] }
  0x1b   :  { %1633 = vmatprep.subr.bf16.mxu0 %v1763_v8  ;;  %1642 = vmatprep.subr.bf16.mxu1 %v1763_v8  ;;  %v267_v9 = vld [vmem:[#allocation2 + $0xa] sm:$0x3]  ;;  %v271_v16 = vld [vmem:[#allocation2 + $0xc] sm:$0x3]  ;;  %s1766_s15 = smov 32   ;;  %s1767_s16 = smov 40  }
  0x1c   :  { %v265_v10 = vld [vmem:[#allocation2 + $0x9] sm:$0x3]  ;;  %287 = vrot.lane.b32.xlu1 %v267_v9, %s1764_s14  ;;  %v268_v11 = vld [vmem:[#allocation2 + $0x12] sm:$0x3]  ;;  %v269_v14 = vld [vmem:[#allocation2 + $0xb] sm:$0x3] }
  0x1d   :  { %279 = vrot.lane.b32.xlu0 %v265_v10, %s1762_s23  ;;  %v266_v12 = vld [vmem:[#allocation2 + $0x11] sm:$0x3]  ;;  %v270_v13 = vld [vmem:[#allocation2 + $0x13] sm:$0x3]  ;;  %v274_v17 = vld [vmem:[#allocation2 + $0x15] sm:$0x3] }
  0x1e   :  { %v272_v15 = vld [vmem:[#allocation2 + $0x14] sm:$0x3]  ;;  %v273_v18 = vld [vmem:[#allocation2 + $0xd] sm:$0x3]  ;;  %v276_v19 = vld [vmem:[#allocation2 + $0x16] sm:$0x3] }
  0x1f   :  { %v275_v20 = vld [vmem:[#allocation2 + $0xe] sm:$0x3]  ;;  %s1768_s17 = smov 48   ;;  %v177_v21 = vld [vmem:[#allocation2 + $0x9] sm:$0x3]  ;;  %v339_v24 = vld [vmem:[#allocation4 + $0x40] sm:$0xff] }
  0x20   :  { %289 = vrot.lane.b32.xlu1 %v268_v11, %s1764_s14  ;;  %v176_v22 = vld [vmem:[#allocation2 + $0x1] sm:$0x3]  ;;  %v1634_v25 = vpack.c.bf16 %v339_v24, %v338_v23  ;;  %v340_v26 = vld [vmem:[#allocation4 + $0x48] sm:$0xff]  ;;  %v341_v27 = vld [vmem:[#allocation4 + $0x50] sm:$0xff]  ;;  %vm1769_vm0 = vmmov 0   ;;  %v1770_v33 = vmov 0.0  }
  0x21   :  { %281 = vrot.lane.b32.xlu0 %v266_v12, %s1762_s23  ;;  %v179_v28 = vld [vmem:[#allocation2 + $0xa] sm:$0x3]  ;;  %v178_v29 = vld [vmem:[#allocation2 + $0x2] sm:$0x3]  ;;  %v1637_v30 = vpack.c.bf16 %v341_v27, %v340_v26  ;;  %v342_v31 = vld [vmem:[#allocation4 + $0x58] sm:$0xff]  ;;  %1528 = vmatprep.mubr.msk.f32.mxu0 %vm1769_vm0, %v1770_v33  ;;  %vm236_vm1 = vcmask 64512  }
  0x22   :  { %1635 = vmatpush3.bf16.msra.mxu0 %v1634_v25  ;;  %v343_v32 = vld [vmem:[#allocation4 + $0x60] sm:$0xff]  ;;  %1545 = vmatprep.mubr.msk.f32.mxu1 %vm1769_vm0, %v1770_v33  ;;  %v181_v34 = vld [vmem:[#allocation2 + $0xb] sm:$0x3]  ;;  %v515_v37 = vld [vmem:[#allocation2 + $0x19] sm:$0x3]  ;;  %vm239_vm2 = vcmask 130048  }
  0x23   :  { %1636 = vmatprep.subr.bf16.mxu0 %v1763_v8  ;;  %v180_v35 = vld [vmem:[#allocation2 + $0x3] sm:$0x3]  ;;  %v1640_v36 = vpack.c.bf16 %v343_v32, %v342_v31  ;;  %v514_v38 = vld [vmem:[#allocation2 + $0x11] sm:$0x3]  ;;  %v255_v40 = vld [vmem:[#allocation4 + $0x8] sm:$0xff]  ;;  %vm242_vm3 = vcmask 195584  }
  0x24   :  { %297 = vrot.lane.b32.xlu1 %v270_v13, %s1765_s0  ;;  %v254_v39 = vld [vmem:[#allocation4] sm:$0xff]  ;;  %v344_v41 = vld [vmem:[#allocation4 + $0x68] sm:$0xff]  ;;  %v256_v45 = vld [vmem:[#allocation4 + $0x10] sm:$0xff]  ;;  %vm245_vm4 = vcmask 261120   ;;  %vm248_vm5 = vcmask 326656   ;;  %vm251_vm6 = vcmask 392192  }
  0x25   :  { %295 = vrot.lane.b32.xlu0 %v269_v14, %s1765_s0  ;;  %v1643_v42 = vpack.c.bf16 %v255_v40, %v254_v39  ;;  %v183_v43 = vld [vmem:[#allocation2 + $0xc] sm:$0x3]  ;;  %v182_v44 = vld [vmem:[#allocation2 + $0x4] sm:$0x3]  ;;  %v257_v46 = vld [vmem:[#allocation4 + $0x18] sm:$0xff]  ;;  %vm355_vm7 = vcmask 457728  }
  0x26   :  { %1638 = vmatpush3.bf16.msra.mxu0 %v1637_v30  ;;  %v1646_v47 = vpack.c.bf16 %v257_v46, %v256_v45  ;;  %v517_v48 = vld [vmem:[#allocation2 + $0x1a] sm:$0x3]  ;;  %v516_v49 = vld [vmem:[#allocation2 + $0x12] sm:$0x3]  ;;  %v258_v50 = vld [vmem:[#allocation4 + $0x20] sm:$0xff]  ;;  %v351_v46 = vlaneseq  ;;  %vm1365_vm8 = vcmask 254976  }
  0x27   :  { %1639 = vmatprep.subr.bf16.mxu0 %v1763_v8  ;;  %1644 = vmatpush3.bf16.msra.mxu1 %v1643_v42  ;;  %v259_v51 = vld [vmem:[#allocation4 + $0x28] sm:$0xff]  ;;  %v184_v54 = vld [vmem:[#allocation2 + $0x5] sm:$0x3]  ;;  %v260_v55 = vld [vmem:[#allocation4 + $0x30] sm:$0xff]  ;;  %s1772_s20 = smov [#allocation7]  }
  0x28   :  { %305 = vrot.lane.b32.xlu1 %v272_v15, %s1766_s15  ;;  %1645 = vmatprep.subr.bf16.mxu1 %v1763_v8  ;;  %v1649_v52 = vpack.c.bf16 %v259_v51, %v258_v50  ;;  %v185_v53 = vld [vmem:[#allocation2 + $0xd] sm:$0x3]  ;;  %v519_v56 = vld [vmem:[#allocation2 + $0x1b] sm:$0x3]  ;;  %v518_v57 = vld [vmem:[#allocation2 + $0x13] sm:$0x3] }
  0x29   :  { %303 = vrot.lane.b32.xlu0 %v271_v16, %s1766_s15  ;;  %v187_v58 = vld [vmem:[#allocation2 + $0xe] sm:$0x3]  ;;  %v186_v59 = vld [vmem:[#allocation2 + $0x6] sm:$0x3]  ;;  %v521_v60 = vld [vmem:[#allocation2 + $0x1c] sm:$0x3] }
  0x2a   :  { %1641 = vmatpush3.bf16.msra.mxu0 %v1640_v36  ;;  %v520_v61 = vld [vmem:[#allocation2 + $0x14] sm:$0x3]  ;;  %v523_v62 = vld [vmem:[#allocation2 + $0x1d] sm:$0x3]  ;;  %v524_v1 = vld [vmem:[#allocation2 + $0x16] sm:$0x3] }
  0x2b   :  { %1526 = vmatprep.subr.mxu0 %v1770_v33  ;;  %1647 = vmatpush3.bf16.msra.mxu1 %v1646_v47  ;;  %v522_v63 = vld [vmem:[#allocation2 + $0x15] sm:$0x3]  ;;  %v525_v0 = vld [vmem:[#allocation2 + $0x1e] sm:$0x3]  ;;  %v682_v2 = vld [vmem:[#allocation2 + $0x21] sm:$0x3] }
  0x2c   :  { %313 = vrot.lane.b32.xlu1 %v274_v17, %s1767_s16  ;;  %1648 = vmatprep.subr.bf16.mxu1 %v1763_v8  ;;  %v681_v3 = vld [vmem:[#allocation2 + $0x19] sm:$0x3]  ;;  %v684_v4 = vld [vmem:[#allocation2 + $0x22] sm:$0x3]  ;;  %v685_v7 = vld [vmem:[#allocation2 + $0x1b] sm:$0x3] }
  0x2d   :  { %311 = vrot.lane.b32.xlu0 %v273_v18, %s1767_s16  ;;  %v683_v5 = vld [vmem:[#allocation2 + $0x1a] sm:$0x3]  ;;  %v686_v6 = vld [vmem:[#allocation2 + $0x23] sm:$0x3]  ;;  %v849_v9 = vld [vmem:[#allocation2 + $0x29] sm:$0x3] }
  0x2e   :  { %1527 = vmatpush3.msra.mxu0 %v344_v41  ;;  %v848_v10 = vld [vmem:[#allocation2 + $0x21] sm:$0x3]  ;;  %v688_v11 = vld [vmem:[#allocation2 + $0x24] sm:$0x3]  ;;  %v687_v12 = vld [vmem:[#allocation2 + $0x1c] sm:$0x3] }
  0x2f   :  { %1651 = vmatprep.subr.bf16.mxu0 %v1763_v8  ;;  %1650 = vmatpush3.bf16.msra.mxu1 %v1649_v52  ;;  %v851_v13 = vld [vmem:[#allocation2 + $0x2a] sm:$0x3]  ;;  %v850_v14 = vld [vmem:[#allocation2 + $0x22] sm:$0x3]  ;;  %v690_v15 = vld [vmem:[#allocation2 + $0x25] sm:$0x3] }
  0x30   :  { %321 = vrot.lane.b32.xlu1 %v276_v19, %s1768_s17  ;;  %1543 = vmatprep.subr.mxu1 %v1770_v33  ;;  %v689_v16 = vld [vmem:[#allocation2 + $0x1d] sm:$0x3]  ;;  %v853_v17 = vld [vmem:[#allocation2 + $0x2b] sm:$0x3]  ;;  %v852_v18 = vld [vmem:[#allocation2 + $0x23] sm:$0x3] }
  0x31   :  { %319 = vrot.lane.b32.xlu0 %v275_v20, %s1768_s17  ;;  %v692_v19 = vld [vmem:[#allocation2 + $0x26] sm:$0x3]  ;;  %v691_v20 = vld [vmem:[#allocation2 + $0x1e] sm:$0x3]  ;;  %v857_v23 = vld [vmem:[#allocation2 + $0x2d] sm:$0x3] }
  0x32   :  { %v856_v24 = vld [vmem:[#allocation2 + $0x25] sm:$0x3]  ;;  %v859_v25 = vld [vmem:[#allocation2 + $0x2e] sm:$0x3]  ;;  %v1015_v30 = vld [vmem:[#allocation2 + $0x29] sm:$0x3] }
  0x33   :  { %1544 = vmatpush3.msra.mxu1 %v260_v55  ;;  %v858_v26 = vld [vmem:[#allocation2 + $0x26] sm:$0x3]  ;;  %v264_v39 = vld [vmem:[#allocation2 + $0x10] sm:$0x3]  ;;  %v1020_v40 = vld [vmem:[#allocation2 + $0x33] sm:$0x3] }
  0x34   :  { %192 = vrot.lane.b32.xlu1 %v177_v21, %s1762_s23  ;;  %1660 = vmatprep.subr.bf16.mxu1 %v1763_v8  ;;  %v855_v21 = vld [vmem:[#allocation2 + $0x2c] sm:$0x3]  ;;  %v1182_v50 = vld [vmem:[#allocation2 + $0x31] sm:$0x3]  ;;  %s1373_s21 = sshll.u32 %s1772_s20, 4  ;;  %s1374_s21 = int_to_ptr.vmem [resolvable:$true] %s1373_s21 }
  0x35   :  { %190 = vrot.lane.b32.xlu0 %v176_v22, %s1762_s23  ;;  %v854_v22 = vld [vmem:[#allocation2 + $0x24] sm:$0x3]  ;;  %v1019_v41 = vld [vmem:[#allocation2 + $0x2b] sm:$0x3]  ;;  %s1732_s22 = scalar_lea.vmem %s1374_s21, 64  ;;  %p1737_p9 = scmp.lt.s32.totalorder %s1374_s21, %s1374_s21 }
  0x36   :  { %p1733_p8 = scmp.ne.s32.totalorder %s1374_s21, %s1732_s22  ;;  %p1738_p10 = scmp.lt.s32.totalorder %s1732_s22, %s1732_s22 }
  0x38   :  { %200 = vrot.lane.b32.xlu1 %v179_v28, %s1764_s14  ;;  %p1739_p11 = por %p1738_p10, %p1737_p9 }
  0x39   :  { %198 = vrot.lane.b32.xlu0 %v178_v29, %s1764_s14  ;;  %v1016_v29 = vld [vmem:[#allocation2 + $0x31] sm:$0x3] }
  0x3a   :  { %p1740_p12 = pnand %p1739_p11, %p1733_p8 }
  0x3c   :  { %208 = vrot.lane.b32.xlu1 %v181_v34, %s1765_s0  ;;  %v1018_v34 = vld [vmem:[#allocation2 + $0x32] sm:$0x3] }
  0x3d   :  { %206 = vrot.lane.b32.xlu0 %v180_v35, %s1765_s0  ;;  %v1017_v35 = vld [vmem:[#allocation2 + $0x2a] sm:$0x3] }
  0x40   :  { %530 = vrot.lane.b32.xlu1 %v515_v37, %s1762_s23 }
  0x41   :  { %528 = vrot.lane.b32.xlu0 %v514_v38, %s1762_s23  ;;  %v263_v38 = vld [vmem:[#allocation2 + $0x8] sm:$0x3] }
  0x44   :  { %216 = vrot.lane.b32.xlu1 %v183_v43, %s1766_s15 }
  0x45   :  { %214 = vrot.lane.b32.xlu0 %v182_v44, %s1766_s15  ;;  %v1771_v44 = vmov 1983009808  }
  0x46   :  { %v349_v45 = vunpack.c.l.s4 %v1771_v44  ;;  %v1193_v44 = vld [vmem:[#allocation2 + $0x3e] sm:$0x3] }
  0x48   :  { %538 = vrot.lane.b32.xlu1 %v517_v48, %s1764_s14 }
  0x49   :  { %536 = vrot.lane.b32.xlu0 %v516_v49, %s1764_s14  ;;  %v1183_v49 = vld [vmem:[#allocation2 + $0x39] sm:$0x3] }
  0x4c   :  { %224 = vrot.lane.b32.xlu1 %v185_v53, %s1767_s16  ;;  %v350_v53 = vunpack.c.0.s8 %v349_v45 }
  0x4d   :  { %222 = vrot.lane.b32.xlu0 %v184_v54, %s1767_s16  ;;  %v352_v54 = vshrl.u32 %v351_v46, 7 }
  0x50   :  { %546 = vrot.lane.b32.xlu1 %v519_v56, %s1765_s0 }
  0x51   :  { %544 = vrot.lane.b32.xlu0 %v518_v57, %s1765_s0 }
  0x54   :  { %232 = vrot.lane.b32.xlu1 %v187_v58, %s1768_s17 }
  0x55   :  { %230 = vrot.lane.b32.xlu0 %v186_v59, %s1768_s17 }
  0x58   :  { %554 = vrot.lane.b32.xlu1 %v521_v60, %s1766_s15 }
  0x59   :  { %552 = vrot.lane.b32.xlu0 %v520_v61, %s1766_s15  ;;  %v1022_v61 = vld [vmem:[#allocation2 + $0x34] sm:$0x3] }
  0x5c   :  { %562 = vrot.lane.b32.xlu1 %v523_v62, %s1767_s16  ;;  %v1021_v62 = vld [vmem:[#allocation2 + $0x2c] sm:$0x3] }
  0x5d   :  { %560 = vrot.lane.b32.xlu0 %v522_v63, %s1767_s16 }
  0x60   :  { %570 = vrot.lane.b32.xlu1 %v525_v0, %s1768_s17 }
  0x61   :  { %568 = vrot.lane.b32.xlu0 %v524_v1, %s1768_s17 }
  0x64   :  { %697 = vrot.lane.b32.xlu1 %v682_v2, %s1762_s23  ;;  %v1923_v2 = vsub.s32 %v350_v53, %v352_v54 }
  0x65   :  { %695 = vrot.lane.b32.xlu0 %v681_v3, %s1762_s23 }
  0x68   :  { %705 = vrot.lane.b32.xlu1 %v684_v4, %s1764_s14  ;;  %v587_v4 = vld [vmem:[#allocation4 + $0x70] sm:$0xff] }
  0x69   :  { %703 = vrot.lane.b32.xlu0 %v683_v5, %s1764_s14  ;;  %v588_v5 = vld [vmem:[#allocation4 + $0x78] sm:$0xff] }
  0x6c   :  { %713 = vrot.lane.b32.xlu1 %v686_v6, %s1765_s0 }
  0x6d   :  { %711 = vrot.lane.b32.xlu0 %v685_v7, %s1765_s0 }
  0x70   :  { %864 = vrot.lane.b32.xlu1 %v849_v9, %s1762_s23 }
  0x71   :  { %862 = vrot.lane.b32.xlu0 %v848_v10, %s1762_s23  ;;  %v1185_v10 = vld [vmem:[#allocation2 + $0x3a] sm:$0x3] }
  0x74   :  { %721 = vrot.lane.b32.xlu1 %v688_v11, %s1766_s15  ;;  %v1652_v11 = vpack.c.bf16 %v588_v5, %v587_v4 }
  0x75   :  { %719 = vrot.lane.b32.xlu0 %v687_v12, %s1766_s15 }
  0x78   :  { %872 = vrot.lane.b32.xlu1 %v851_v13, %s1764_s14 }
  0x79   :  { %870 = vrot.lane.b32.xlu0 %v850_v14, %s1764_s14 }
  0x7c   :  { %729 = vrot.lane.b32.xlu1 %v690_v15, %s1767_s16  ;;  %v1184_v15 = vld [vmem:[#allocation2 + $0x32] sm:$0x3] }
  0x7d   :  { %727 = vrot.lane.b32.xlu0 %v689_v16, %s1767_s16  ;;  %v589_v16 = vld [vmem:[#allocation4 + $0x80] sm:$0xff] }
  0x80   :  { %880 = vrot.lane.b32.xlu1 %v853_v17, %s1765_s0  ;;  %v590_v17 = vld [vmem:[#allocation4 + $0x88] sm:$0xff] }
  0x81   :  { %878 = vrot.lane.b32.xlu0 %v852_v18, %s1765_s0  ;;  %v1024_v18 = vld [vmem:[#allocation2 + $0x35] sm:$0x3] }
  0x84   :  { %737 = vrot.lane.b32.xlu1 %v692_v19, %s1768_s17  ;;  %v1655_v19 = vpack.c.bf16 %v590_v17, %v589_v16 }
  0x85   :  { %735 = vrot.lane.b32.xlu0 %v691_v20, %s1768_s17 }
  0x88   :  { %888 = vrot.lane.b32.xlu1 %v855_v21, %s1766_s15 }
  0x89   :  { %886 = vrot.lane.b32.xlu0 %v854_v22, %s1766_s15  ;;  %v1023_v22 = vld [vmem:[#allocation2 + $0x2d] sm:$0x3] }
  0x8c   :  { %896 = vrot.lane.b32.xlu1 %v857_v23, %s1767_s16  ;;  %v591_v23 = vld [vmem:[#allocation4 + $0x90] sm:$0xff] }
  0x8d   :  { %894 = vrot.lane.b32.xlu0 %v856_v24, %s1767_s16  ;;  %v592_v24 = vld [vmem:[#allocation4 + $0x98] sm:$0xff] }
  0x8e   :  { %v288_v27 = vpop.permute.xlu1 %287 }
  0x8f   :  { %v280_v28 = vpop.permute.xlu0 %279 }
  0x90   :  { %904 = vrot.lane.b32.xlu1 %v859_v25, %s1768_s17  ;;  %v325_v47 = vsel %vm236_vm1, %v263_v38, %v280_v28  ;;  %v1187_v25 = vld [vmem:[#allocation2 + $0x3b] sm:$0x3] }
  0x91   :  { %902 = vrot.lane.b32.xlu0 %v858_v26, %s1768_s17  ;;  %v327_v56 = vsel %vm239_vm2, %v325_v47, %v288_v27  ;;  %v1658_v26 = vpack.c.bf16 %v592_v24, %v591_v23  ;;  %v1192_v47 = vld [vmem:[#allocation2 + $0x36] sm:$0x3] }
  0x92   :  { %v290_v31 = vpop.permute.xlu1 %289 }
  0x93   :  { %v282_v32 = vpop.permute.xlu0 %281 }
  0x94   :  { %1031 = vrot.lane.b32.xlu1 %v1016_v29, %s1762_s23  ;;  %v326_v48 = vsel %vm236_vm1, %v264_v39, %v282_v32  ;;  %v1186_v29 = vld [vmem:[#allocation2 + $0x33] sm:$0x3] }
  0x95   :  { %1029 = vrot.lane.b32.xlu0 %v1015_v30, %s1762_s23  ;;  %v328_v55 = vsel %vm239_vm2, %v326_v48, %v290_v31  ;;  %v1026_v30 = vld [vmem:[#allocation2 + $0x36] sm:$0x3]  ;;  %v1188_v39 = vld [vmem:[#allocation2 + $0x34] sm:$0x3]  ;;  %v175_v48 = vld [vmem:[#allocation2 + $0x8] sm:$0x3] }
  0x96   :  { %v298_v36 = vpop.permute.xlu1 %297 }
  0x97   :  { %v296_v37 = vpop.permute.xlu0 %295  ;;  %v330_v57 = vsel %vm242_vm3, %v328_v55, %v298_v36  ;;  %v1189_v36 = vld [vmem:[#allocation2 + $0x3c] sm:$0x3] }
  0x98   :  { %1039 = vrot.lane.b32.xlu1 %v1018_v34, %s1764_s14  ;;  %v329_v58 = vsel %vm242_vm3, %v327_v56, %v296_v37  ;;  %v1025_v34 = vld [vmem:[#allocation2 + $0x2e] sm:$0x3] }
  0x99   :  { %1037 = vrot.lane.b32.xlu0 %v1017_v35, %s1764_s14  ;;  %v593_v35 = vld [vmem:[#allocation4 + $0xa0] sm:$0xff] }
  0x9a   :  { %v306_v42 = vpop.permute.xlu1 %305 }
  0x9b   :  { %v304_v43 = vpop.permute.xlu0 %303  ;;  %v332_v59 = vsel %vm245_vm4, %v330_v57, %v306_v42 }
  0x9c   :  { %1047 = vrot.lane.b32.xlu1 %v1020_v40, %s1765_s0  ;;  %v331_v60 = vsel %vm245_vm4, %v329_v58, %v304_v43  ;;  %v1191_v40 = vld [vmem:[#allocation2 + $0x3d] sm:$0x3]  ;;  %v1190_v43 = vld [vmem:[#allocation2 + $0x35] sm:$0x3] }
  0x9d   :  { %1045 = vrot.lane.b32.xlu0 %v1019_v41, %s1765_s0 }
  0x9e   :  { %v314_v51 = vpop.permute.xlu1 %313 }
  0x9f   :  { %v312_v52 = vpop.permute.xlu0 %311  ;;  %v334_v63 = vsel %vm248_vm5, %v332_v59, %v314_v51 }
  0xa0   :  { %1198 = vrot.lane.b32.xlu1 %v1183_v49, %s1762_s23  ;;  %v333_v0 = vsel %vm248_vm5, %v331_v60, %v312_v52  ;;  %v174_v49 = vld [vmem:[#allocation2] sm:$0x3] }
  0xa1   :  { %1196 = vrot.lane.b32.xlu0 %v1182_v50, %s1762_s23 }
  0xa2   :  { %v322_v1 = vpop.permute.xlu1 %321 }
  0xa3   :  { %v320_v3 = vpop.permute.xlu0 %319  ;;  %v336_v6 = vsel %vm251_vm6, %v334_v63, %v322_v1  ;;  %v755_v1 = vld [vmem:[#allocation4 + $0xb0] sm:$0xff] }
  0xa4   :  { %v335_v7 = vsel %vm251_vm6, %v333_v0, %v320_v3  ;;  %1055 = vrot.lane.b32.xlu1 %v1022_v61, %s1766_s15  ;;  %v754_v0 = vld [vmem:[#allocation4 + $0xa8] sm:$0xff] }
  0xa5   :  { %v347_v9 = vcombine.low %v335_v7, %v336_v6  ;;  %1053 = vrot.lane.b32.xlu0 %v1021_v62, %s1766_s15  ;;  %v1661_v6 = vpack.c.bf16 %v755_v1, %v754_v0  ;;  %v679_v0 = vld [vmem:[#allocation2 + $0x18] sm:$0x3] }
  0xa6   :  { %v193_v13 = vpop.permute.xlu1 %192 }
  0xa7   :  { %v354_v12 = vrot.slane %v347_v9, %v1923_v2  ;;  %v191_v14 = vpop.permute.xlu0 %190  ;;  %v238_v50 = vsel %vm236_vm1, %v175_v48, %v193_v13  ;;  %v513_v13 = vld [vmem:[#allocation2 + $0x18] sm:$0x3] }
  0xa8   :  { %1206 = vrot.lane.b32.xlu1 %v1185_v10, %s1764_s14  ;;  %v237_v51 = vsel %vm236_vm1, %v174_v49, %v191_v14  ;;  %v512_v14 = vld [vmem:[#allocation2 + $0x10] sm:$0x3]  ;;  %v925_v49 = vld [vmem:[#allocation4 + $0x100] sm:$0xff] }
  0xa9   :  { %1529 = vmatmul.mubr.msk.f32.vlgmr.msra.gmra.mrb[0].mxu0 %vm355_vm7, %v354_v12  ;;  %1204 = vrot.lane.b32.xlu0 %v1184_v15, %s1764_s14  ;;  %v757_v12 = vld [vmem:[#allocation4 + $0xc0] sm:$0xff] }
  0xaa   :  { %1653 = vmatpush3.bf16.msra.mxu0 %v1652_v11  ;;  %v201_v20 = vpop.permute.xlu1 %200  ;;  %1562 = vmatprep.mubr.msk.f32.mxu0 %vm1769_vm0, %v1770_v33  ;;  %v756_v11 = vld [vmem:[#allocation4 + $0xb8] sm:$0xff] }
  0xab   :  { %v199_v21 = vpop.permute.xlu0 %198  ;;  %1654 = vmatprep.subr.bf16.mxu0 %v1763_v8  ;;  %v241_v54 = vsel %vm239_vm2, %v238_v50, %v201_v20  ;;  %v1664_v15 = vpack.c.bf16 %v757_v12, %v756_v11  ;;  %v758_v20 = vld [vmem:[#allocation4 + $0xc8] sm:$0xff] }
  0xac   :  { %1063 = vrot.lane.b32.xlu1 %v1024_v18, %s1767_s16  ;;  %v240_v55 = vsel %vm239_vm2, %v237_v51, %v199_v21  ;;  %v759_v21 = vld [vmem:[#allocation4 + $0xd0] sm:$0xff]  ;;  %v926_v50 = vld [vmem:[#allocation4 + $0x108] sm:$0xff] }
  0xad   :  { %1061 = vrot.lane.b32.xlu0 %v1023_v22, %s1767_s16  ;;  %v1676_v51 = vpack.c.bf16 %v926_v50, %v925_v49  ;;  %v1255_v49 = vld [vmem:[#allocation4 + $0x150] sm:$0xff]  ;;  %v1256_v50 = vld [vmem:[#allocation4 + $0x158] sm:$0xff] }
  0xae   :  { %1656 = vmatpush3.bf16.msra.mxu0 %v1655_v19  ;;  %v209_v27 = vpop.permute.xlu1 %208 }
  0xaf   :  { %v207_v28 = vpop.permute.xlu0 %206  ;;  %1657 = vmatprep.subr.bf16.mxu0 %v1763_v8  ;;  %v244_v56 = vsel %vm242_vm3, %v241_v54, %v209_v27 }
  0xb0   :  { %1214 = vrot.lane.b32.xlu1 %v1187_v25, %s1765_s0  ;;  %v243_v57 = vsel %vm242_vm3, %v240_v55, %v207_v28  ;;  %v1667_v28 = vpack.c.bf16 %v759_v21, %v758_v20 }
  0xb1   :  { %1212 = vrot.lane.b32.xlu0 %v1186_v29, %s1765_s0 }
  0xb2   :  { %1659 = vmatpush3.bf16.msra.mxu0 %v1658_v26  ;;  %v531_v31 = vpop.permute.xlu1 %530 }
  0xb3   :  { %v529_v32 = vpop.permute.xlu0 %528  ;;  %1560 = vmatprep.subr.mxu0 %v1770_v33  ;;  %v575_v16 = vsel %vm236_vm1, %v513_v13, %v531_v31 }
  0xb4   :  { %1071 = vrot.lane.b32.xlu1 %v1026_v30, %s1768_s17  ;;  %v574_v17 = vsel %vm236_vm1, %v512_v14, %v529_v32 }
  0xb5   :  { %1069 = vrot.lane.b32.xlu0 %v1025_v34, %s1768_s17  ;;  %v921_v34 = vld [vmem:[#allocation4 + $0xe0] sm:$0xff] }
  0xb6   :  { %1561 = vmatpush3.msra.mxu0 %v593_v35  ;;  %v217_v37 = vpop.permute.xlu1 %216  ;;  %v922_v35 = vld [vmem:[#allocation4 + $0xe8] sm:$0xff] }
  0xb7   :  { %v215_v38 = vpop.permute.xlu0 %214  ;;  %1669 = vmatprep.subr.bf16.mxu0 %v1763_v8  ;;  %v247_v58 = vsel %vm245_vm4, %v244_v56, %v217_v37  ;;  %v927_v56 = vld [vmem:[#allocation4 + $0x110] sm:$0xff] }
  0xb8   :  { %1222 = vrot.lane.b32.xlu1 %v1189_v36, %s1766_s15  ;;  %v246_v59 = vsel %vm245_vm4, %v243_v57, %v215_v38 }
  0xb9   :  { %1220 = vrot.lane.b32.xlu0 %v1188_v39, %s1766_s15  ;;  %v1670_v39 = vpack.c.bf16 %v922_v35, %v921_v34 }
  0xba   :  { %v539_v41 = vpop.permute.xlu1 %538 }
  0xbb   :  { %v537_v42 = vpop.permute.xlu0 %536  ;;  %v577_v22 = vsel %vm239_vm2, %v575_v16, %v539_v41 }
  0xbc   :  { %1230 = vrot.lane.b32.xlu1 %v1191_v40, %s1767_s16  ;;  %v576_v23 = vsel %vm239_vm2, %v574_v17, %v537_v42  ;;  %v1088_v17 = vld [vmem:[#allocation4 + $0x118] sm:$0xff] }
  0xbd   :  { %1228 = vrot.lane.b32.xlu0 %v1190_v43, %s1767_s16  ;;  %v760_v43 = vld [vmem:[#allocation4 + $0xd8] sm:$0xff] }
  0xbe   :  { %v225_v45 = vpop.permute.xlu1 %224 }
  0xbf   :  { %v223_v46 = vpop.permute.xlu0 %222  ;;  %v250_v60 = vsel %vm248_vm5, %v247_v58, %v225_v45  ;;  %v924_v45 = vld [vmem:[#allocation4 + $0xf8] sm:$0xff] }
  0xc0   :  { %1238 = vrot.lane.b32.xlu1 %v1193_v44, %s1768_s17  ;;  %v249_v61 = vsel %vm248_vm5, %v246_v59, %v223_v46  ;;  %v923_v44 = vld [vmem:[#allocation4 + $0xf0] sm:$0xff] }
  0xc1   :  { %1236 = vrot.lane.b32.xlu0 %v1192_v47, %s1768_s17  ;;  %v1673_v46 = vpack.c.bf16 %v924_v45, %v923_v44 }
  0xc2   :  { %v547_v52 = vpop.permute.xlu1 %546 }
  0xc3   :  { %v545_v53 = vpop.permute.xlu0 %544  ;;  %v579_v24 = vsel %vm242_vm3, %v577_v22, %v547_v52 }
  0xc4   :  { %v578_v25 = vsel %vm242_vm3, %v576_v23, %v545_v53 }
  0xc6   :  { %v233_v62 = vpop.permute.xlu1 %232 }
  0xc7   :  { %v231_v63 = vpop.permute.xlu0 %230  ;;  %v253_v3 = vsel %vm251_vm6, %v250_v60, %v233_v62 }
  0xc8   :  { %v252_v4 = vsel %vm251_vm6, %v249_v61, %v231_v63  ;;  %v680_v63 = vld [vmem:[#allocation2 + $0x20] sm:$0x3] }
  0xc9   :  { %v430_v5 = vcombine.low %v252_v4, %v253_v3 }
  0xca   :  { %v555_v9 = vpop.permute.xlu1 %554 }
  0xcb   :  { %v437_v7 = vrot.slane %v430_v5, %v1923_v2  ;;  %v553_v10 = vpop.permute.xlu0 %552  ;;  %v581_v26 = vsel %vm245_vm4, %v579_v24, %v555_v9 }
  0xcc   :  { %v580_v27 = vsel %vm245_vm4, %v578_v25, %v553_v10 }
  0xcd   :  { %1546 = vmatmul.mubr.msk.f32.vlgmr.msra.gmra.mrb[0].mxu1 %vm355_vm7, %v437_v7 }
  0xce   :  { %1662 = vmatpush3.bf16.msra.mxu1 %v1661_v6  ;;  %1579 = vmatprep.mubr.msk.f32.mxu1 %vm1769_vm0, %v1770_v33  ;;  %v563_v18 = vpop.permute.xlu1 %562 }
  0xcf   :  { %v561_v19 = vpop.permute.xlu0 %560  ;;  %1663 = vmatprep.subr.bf16.mxu1 %v1763_v8  ;;  %v583_v29 = vsel %vm248_vm5, %v581_v26, %v563_v18  ;;  %v1089_v18 = vld [vmem:[#allocation4 + $0x120] sm:$0xff]  ;;  %v1090_v26 = vld [vmem:[#allocation4 + $0x128] sm:$0xff] }
  0xd0   :  { %v582_v30 = vsel %vm248_vm5, %v580_v27, %v561_v19  ;;  %v1679_v22 = vpack.c.bf16 %v1089_v18, %v1088_v17  ;;  %v1091_v27 = vld [vmem:[#allocation4 + $0x130] sm:$0xff]  ;;  %v1013_v17 = vld [vmem:[#allocation2 + $0x28] sm:$0x3] }
  0xd2   :  { %1665 = vmatpush3.bf16.msra.mxu1 %v1664_v15  ;;  %v571_v31 = vpop.permute.xlu1 %570 }
  0xd3   :  { %v569_v32 = vpop.permute.xlu0 %568  ;;  %1666 = vmatprep.subr.bf16.mxu1 %v1763_v8  ;;  %v585_v36 = vsel %vm251_vm6, %v583_v29, %v571_v31  ;;  %v846_v29 = vld [vmem:[#allocation2 + $0x20] sm:$0x3] }
  0xd4   :  { %v584_v37 = vsel %vm251_vm6, %v582_v30, %v569_v32  ;;  %v1682_v30 = vpack.c.bf16 %v1091_v27, %v1090_v26 }
  0xd5   :  { %v596_v38 = vcombine.low %v584_v37, %v585_v36  ;;  %v1092_v36 = vld [vmem:[#allocation4 + $0x138] sm:$0xff]  ;;  %v1093_v37 = vld [vmem:[#allocation4 + $0x140] sm:$0xff] }
  0xd6   :  { %1668 = vmatpush3.bf16.msra.mxu1 %v1667_v28  ;;  %v698_v41 = vpop.permute.xlu1 %697  ;;  %v847_v28 = vld [vmem:[#allocation2 + $0x28] sm:$0x3]  ;;  %v1685_v44 = vpack.c.bf16 %v1093_v37, %v1092_v36 }
  0xd7   :  { %v603_v40 = vrot.slane %v596_v38, %v1923_v2  ;;  %v696_v42 = vpop.permute.xlu0 %695  ;;  %1577 = vmatprep.subr.mxu1 %v1770_v33  ;;  %v742_v1 = vsel %vm236_vm1, %v680_v63, %v698_v41 }
  0xd8   :  { %v741_v3 = vsel %vm236_vm1, %v679_v0, %v696_v42  ;;  %v1259_v0 = vld [vmem:[#allocation4 + $0x170] sm:$0xff] }
  0xd9   :  { %1563 = vmatmul.mubr.msk.f32.vlgmr.msra.gmra.mrb[2].mxu0 %vm355_vm7, %v603_v40 }
  0xda   :  { %1578 = vmatpush3.msra.mxu1 %v760_v43  ;;  %1671 = vmatpush3.bf16.msra.mxu0 %v1670_v39  ;;  %v706_v47 = vpop.permute.xlu1 %705 }
  0xdb   :  { %v704_v48 = vpop.permute.xlu0 %703  ;;  %1672 = vmatprep.subr.bf16.mxu0 %v1763_v8  ;;  %1596 = vmatprep.mubr.msk.f32.mxu0 %vm1769_vm0, %v1770_v33  ;;  %v744_v6 = vsel %vm239_vm2, %v742_v1, %v706_v47  ;;  %v1260_v1 = vld [vmem:[#allocation4 + $0x178] sm:$0xff] }
  0xdc   :  { %1678 = vmatprep.subr.bf16.mxu1 %v1763_v8  ;;  %v743_v7 = vsel %vm239_vm2, %v741_v3, %v704_v48  ;;  %v1694_v3 = vpack.c.bf16 %v1260_v1, %v1259_v0 }
  0xde   :  { %1674 = vmatpush3.bf16.msra.mxu0 %v1673_v46  ;;  %v714_v52 = vpop.permute.xlu1 %713 }
  0xdf   :  { %v712_v53 = vpop.permute.xlu0 %711  ;;  %1675 = vmatprep.subr.bf16.mxu0 %v1763_v8  ;;  %v746_v9 = vsel %vm242_vm3, %v744_v6, %v714_v52 }
  0xe0   :  { %v745_v10 = vsel %vm242_vm3, %v743_v7, %v712_v53 }
  0xe2   :  { %1677 = vmatpush3.bf16.msra.mxu0 %v1676_v51  ;;  %v865_v54 = vpop.permute.xlu1 %864 }
  0xe3   :  { %v863_v55 = vpop.permute.xlu0 %862  ;;  %1594 = vmatprep.subr.mxu0 %v1770_v33  ;;  %v909_v31 = vsel %vm236_vm1, %v847_v28, %v865_v54  ;;  %v1688_v54 = vpack.c.bf16 %v1256_v50, %v1255_v49 }
  0xe4   :  { %v908_v32 = vsel %vm236_vm1, %v846_v29, %v863_v55 }
  0xe6   :  { %1595 = vmatpush3.msra.mxu0 %v927_v56  ;;  %v722_v57 = vpop.permute.xlu1 %721 }
  0xe7   :  { %v720_v58 = vpop.permute.xlu0 %719  ;;  %1687 = vmatprep.subr.bf16.mxu0 %v1763_v8  ;;  %v748_v11 = vsel %vm245_vm4, %v746_v9, %v722_v57  ;;  %v1261_v9 = vld [vmem:[#allocation4 + $0x180] sm:$0xff] }
  0xe8   :  { %v747_v12 = vsel %vm245_vm4, %v745_v10, %v720_v58  ;;  %v1094_v58 = vld [vmem:[#allocation4 + $0x148] sm:$0xff] }
  0xea   :  { %v873_v59 = vpop.permute.xlu1 %872 }
  0xeb   :  { %v871_v60 = vpop.permute.xlu0 %870  ;;  %v911_v38 = vsel %vm239_vm2, %v909_v31, %v873_v59  ;;  %v1257_v59 = vld [vmem:[#allocation4 + $0x160] sm:$0xff] }
  0xec   :  { %v910_v39 = vsel %vm239_vm2, %v908_v32, %v871_v60  ;;  %v1258_v60 = vld [vmem:[#allocation4 + $0x168] sm:$0xff] }
  0xee   :  { %v730_v61 = vpop.permute.xlu1 %729 }
  0xef   :  { %v728_v62 = vpop.permute.xlu0 %727  ;;  %v750_v13 = vsel %vm248_vm5, %v748_v11, %v730_v61  ;;  %v1691_v61 = vpack.c.bf16 %v1258_v60, %v1257_v59 }
  0xf0   :  { %v749_v14 = vsel %vm248_vm5, %v747_v12, %v728_v62 }
  0xf2   :  { %v881_v4 = vpop.permute.xlu1 %880 }
  0xf3   :  { %v879_v5 = vpop.permute.xlu0 %878  ;;  %v913_v40 = vsel %vm242_vm3, %v911_v38, %v881_v4  ;;  %v1180_v38 = vld [vmem:[#allocation2 + $0x30] sm:$0x3] }
  0xf4   :  { %v912_v41 = vsel %vm242_vm3, %v910_v39, %v879_v5 }
  0xf6   :  { %v738_v15 = vpop.permute.xlu1 %737 }
  0xf7   :  { %v736_v16 = vpop.permute.xlu0 %735  ;;  %v752_v19 = vsel %vm251_vm6, %v750_v13, %v738_v15  ;;  %v1014_v15 = vld [vmem:[#allocation2 + $0x30] sm:$0x3] }
  0xf8   :  { %v751_v20 = vsel %vm251_vm6, %v749_v14, %v736_v16 }
  0xf9   :  { %v763_v21 = vcombine.low %v751_v20, %v752_v19 }
  0xfa   :  { %v889_v24 = vpop.permute.xlu1 %888 }
  0xfb   :  { %v770_v23 = vrot.slane %v763_v21, %v1923_v2  ;;  %v887_v25 = vpop.permute.xlu0 %886  ;;  %v915_v42 = vsel %vm245_vm4, %v913_v40, %v889_v24 }
  0xfc   :  { %v914_v43 = vsel %vm245_vm4, %v912_v41, %v887_v25 }
  0xfd   :  { %1580 = vmatmul.mubr.msk.f32.vlgmr.msra.gmra.mrb[2].mxu1 %vm355_vm7, %v770_v23 }
  0xfe   :  { %1680 = vmatpush3.bf16.msra.mxu1 %v1679_v22  ;;  %1613 = vmatprep.mubr.msk.f32.mxu1 %vm1769_vm0, %v1770_v33  ;;  %v897_v34 = vpop.permute.xlu1 %896 }
  0xff   :  { %v895_v35 = vpop.permute.xlu0 %894  ;;  %1681 = vmatprep.subr.bf16.mxu1 %v1763_v8  ;;  %v917_v45 = vsel %vm248_vm5, %v915_v42, %v897_v34 }
 0x100   :  { %v916_v46 = vsel %vm248_vm5, %v914_v43, %v895_v35  ;;  %v1181_v35 = vld [vmem:[#allocation2 + $0x38] sm:$0x3] }
 0x102   :  { %1683 = vmatpush3.bf16.msra.mxu1 %v1682_v30  ;;  %v905_v47 = vpop.permute.xlu1 %904 }
 0x103   :  { %v903_v48 = vpop.permute.xlu0 %902  ;;  %1684 = vmatprep.subr.bf16.mxu1 %v1763_v8  ;;  %v919_v51 = vsel %vm251_vm6, %v917_v45, %v905_v47 }
 0x104   :  { %v918_v52 = vsel %vm251_vm6, %v916_v46, %v903_v48 }
 0x105   :  { %v930_v53 = vcombine.low %v918_v52, %v919_v51 }
 0x106   :  { %1686 = vmatpush3.bf16.msra.mxu1 %v1685_v44  ;;  %v1032_v56 = vpop.permute.xlu1 %1031 }
 0x107   :  { %v937_v55 = vrot.slane %v930_v53, %v1923_v2  ;;  %v1030_v57 = vpop.permute.xlu0 %1029  ;;  %1611 = vmatprep.subr.mxu1 %v1770_v33  ;;  %v1076_v18 = vsel %vm236_vm1, %v1014_v15, %v1032_v56 }
 0x109   :  { %1597 = vmatmul.mubr.msk.f32.vlgmr.msra.gmra.mrb[4].mxu0 %vm355_vm7, %v937_v55 }
 0x10a   :  { %1612 = vmatpush3.msra.mxu1 %v1094_v58  ;;  %1689 = vmatpush3.bf16.msra.mxu0 %v1688_v54  ;;  %v1040_v62 = vpop.permute.xlu1 %1039 }
 0x10b   :  { %v1038_v63 = vpop.permute.xlu0 %1037  ;;  %1690 = vmatprep.subr.bf16.mxu0 %v1763_v8  ;;  %1630 = vmatprep.mubr.msk.f32.mxu0 %vm1769_vm0, %v1770_v33  ;;  %v1078_v20 = vsel %vm239_vm2, %v1076_v18, %v1040_v62 }
 0x10e   :  { %1692 = vmatpush3.bf16.msra.mxu0 %v1691_v61  ;;  %v1048_v4 = vpop.permute.xlu1 %1047 }
 0x10f   :  { %v1046_v5 = vpop.permute.xlu0 %1045  ;;  %1693 = vmatprep.subr.bf16.mxu0 %v1763_v8  ;;  %v1075_v8 = vsel %vm236_vm1, %v1013_v17, %v1030_v57  ;;  %v1080_v22 = vsel %vm242_vm3, %v1078_v20, %v1048_v4 }
 0x112   :  { %1695 = vmatpush3.bf16.msra.mxu0 %v1694_v3  ;;  %v1199_v6 = vpop.permute.xlu1 %1198 }
 0x113   :  { %v1197_v7 = vpop.permute.xlu0 %1196  ;;  %1628 = vmatprep.subr.mxu0 %v1770_v33  ;;  %v1077_v33 = vsel %vm239_vm2, %v1075_v8, %v1038_v63  ;;  %v1243_v39 = vsel %vm236_vm1, %v1181_v35, %v1199_v6 }
 0x114   :  { %v1079_v23 = vsel %vm242_vm3, %v1077_v33, %v1046_v5  ;;  %v1242_v41 = vsel %vm236_vm1, %v1180_v38, %v1197_v7 }
 0x116   :  { %1629 = vmatpush3.msra.mxu0 %v1261_v9  ;;  %v1056_v10 = vpop.permute.xlu1 %1055 }
 0x117   :  { %v1054_v11 = vpop.permute.xlu0 %1053  ;;  %v1082_v24 = vsel %vm245_vm4, %v1080_v22, %v1056_v10 }
 0x118   :  { %v1081_v25 = vsel %vm245_vm4, %v1079_v23, %v1054_v11 }
 0x11a   :  { %v1207_v12 = vpop.permute.xlu1 %1206 }
 0x11b   :  { %v1205_v13 = vpop.permute.xlu0 %1204  ;;  %v1245_v42 = vsel %vm239_vm2, %v1243_v39, %v1207_v12 }
 0x11c   :  { %v1244_v44 = vsel %vm239_vm2, %v1242_v41, %v1205_v13  ;;  %v1455_v13 = vld [vmem:[%s2077_s2] ss:$0 sm:$0xff] }
 0x11e   :  { %v1064_v14 = vpop.permute.xlu1 %1063 }
 0x11f   :  { %v1062_v16 = vpop.permute.xlu0 %1061  ;;  %v1084_v26 = vsel %vm248_vm5, %v1082_v24, %v1064_v14 }
 0x120   :  { %v1083_v28 = vsel %vm248_vm5, %v1081_v25, %v1062_v16 }
 0x122   :  { %v1215_v19 = vpop.permute.xlu1 %1214 }
 0x123   :  { %v1213_v21 = vpop.permute.xlu0 %1212  ;;  %v1247_v45 = vsel %vm242_vm3, %v1245_v42, %v1215_v19 }
 0x124   :  { %v1246_v46 = vsel %vm242_vm3, %v1244_v44, %v1213_v21 }
 0x126   :  { %v1072_v27 = vpop.permute.xlu1 %1071 }
 0x127   :  { %v1086_v29 = vsel %vm251_vm6, %v1084_v26, %v1072_v27  ;;  %v1070_v30 = vpop.permute.xlu0 %1069 }
 0x128   :  { %v1085_v31 = vsel %vm251_vm6, %v1083_v28, %v1070_v30 }
 0x129   :  { %v1097_v32 = vcombine.low %v1085_v31, %v1086_v29 }
 0x12a   :  { %v1223_v34 = vpop.permute.xlu1 %1222 }
 0x12b   :  { %v1104_v36 = vrot.slane %v1097_v32, %v1923_v2  ;;  %v1221_v37 = vpop.permute.xlu0 %1220  ;;  %v1249_v47 = vsel %vm245_vm4, %v1247_v45, %v1223_v34 }
 0x12c   :  { %v1248_v48 = vsel %vm245_vm4, %v1246_v46, %v1221_v37 }
 0x12d   :  { %1614 = vmatmul.mubr.msk.f32.vlgmr.msra.gmra.mrb[4].mxu1 %vm355_vm7, %v1104_v36 }
 0x12e   :  { %v1231_v40 = vpop.permute.xlu1 %1230 }
 0x12f   :  { %v1229_v43 = vpop.permute.xlu0 %1228  ;;  %v1251_v49 = vsel %vm248_vm5, %v1249_v47, %v1231_v40 }
 0x130   :  { %v1250_v51 = vsel %vm248_vm5, %v1248_v48, %v1229_v43 }
 0x132   :  { %v1239_v50 = vpop.permute.xlu1 %1238 }
 0x133   :  { %v1253_v52 = vsel %vm251_vm6, %v1251_v49, %v1239_v50  ;;  %v1237_v53 = vpop.permute.xlu0 %1236 }
 0x134   :  { %v1252_v54 = vsel %vm251_vm6, %v1250_v51, %v1237_v53 }
 0x135   :  { %v1264_v55 = vcombine.low %v1252_v54, %v1253_v52 }
 0x137   :  { %v1271_v56 = vrot.slane %v1264_v55, %v1923_v2 }
 0x139   :  { %1631 = vmatmul.mubr.msk.f32.vlgmr.msra.gmra.mrb[6].mxu0 %vm355_vm7, %v1271_v56 }
 0x17c   :  { %v424_v57 = vpop.f32.mrb[0].mxu0 }
 0x17d   :  { %v1530_v58 = vpop.f32.mrb[1].mxu0 }
 0x1a0   :  { %v506_v59 = vpop.f32.mrb[0].mxu1 }
 0x1a1   :  { %v507_v60 = vadd.f32 %v506_v59, %v424_v57  ;;  %v1547_v61 = vpop.f32.mrb[1].mxu1 }
 0x1ac   :  { %v672_v62 = vpop.f32.mrb[2].mxu0 }
 0x1ad   :  { %v676_v63 = vadd.f32 %v672_v62, %v507_v60  ;;  %v1564_v0 = vpop.f32.mrb[3].mxu0 }
 0x1d0   :  { %v839_v1 = vpop.f32.mrb[2].mxu1 }
 0x1d1   :  { %v843_v3 = vadd.f32 %v839_v1, %v676_v63  ;;  %v1581_v4 = vpop.f32.mrb[3].mxu1 }
 0x1dc   :  { %v1006_v5 = vpop.f32.mrb[4].mxu0 }
 0x1dd   :  { %v1010_v6 = vadd.f32 %v1006_v5, %v843_v3  ;;  %v1598_v7 = vpop.f32.mrb[5].mxu0 }
 0x200   :  { %v1173_v9 = vpop.f32.mrb[4].mxu1 }
 0x201   :  { %v1177_v10 = vadd.f32 %v1173_v9, %v1010_v6  ;;  %v1615_v11 = vpop.f32.mrb[5].mxu1 }
 0x20c   :  { %v1340_v12 = vpop.f32.mrb[6].mxu0 }
 0x20d   :  { %v1344_v14 = vadd.f32 %v1340_v12, %v1177_v10  ;;  %v1632_v15 = vpop.f32.mrb[7].mxu0 }
 0x20f   :  { %v1352_v16 = vadd.f32 %v1455_v13, %v1344_v14 }
 0x211   :  { %v1353_v17 = vmax.f32 %v1352_v16, 0.0 }
 0x213   :  { %v1361_v18 = vrot.slane %v1353_v17, %v1923_v2 }
 0x215   :  { %v1362_v19 = vcombine.high %v1361_v18, %v1361_v18  ;;  %1366 = vst.msk [vmem:[#allocation7] sm:$0x3] %vm1365_vm8, %v1361_v18 }
 0x217   :  { %1367 = vst.msk [vmem:[#allocation7 + $0x2] sm:$0x3] %vm1365_vm8, %v1362_v19 }
 0x218   :  { %1743 = shalt.err (!%p1740_p12)
}
 0x219   :  { %s1744_s24 = scalar_lea.hbm %s2078_s3, 64 }
 0x21a   :  { %p1745_p13 = scmp.ne.s32.totalorder %s2078_s3, %s1744_s24  ;;  %p1748_p0 = scmp.lt.u32.totalorder %s1744_s24, %s2078_s3 }
 0x21c   :  { %p1750_p1 = pnand %p1748_p0, %p1745_p13 }
 0x21e   :  { %1753 = shalt.err (!%p1750_p1)
}
 0x21f   :  { %s1773_s29 = smov 2  }
 0x220   :  { %1379 = dma.vmem_to_hbm [thread:$0]  %s1374_s21, 64, %s2078_s3, [#allocation6], %s1766_s15, %s1766_s15, %s1773_s29  }
 0x221   :  { %1758 = dma.done.wait [#allocation6], 64  }
 0x222   :  { %1759 = vsyncadd [#allocation6], 4294967232 }
 0x223   :  { %1383 = vsyncpa [#allocation5], 1 }
 0x224   :  { %1384 = vsyncpa [#allocation6], 1 }
 0x225   :  { %1385 = vsyncmov [#allocation3] }
 0x228   :  { %s1386_s5 = vpop.sfrf %1385 }
 0x229   :  { %p1456_p2 = scmp.ne.s32.totalorder %s1386_s5, 0 }
 0x22b   :  { %1390 = shalt.err (%p1456_p2)  }
 0x22c   :  { %1392 = vsyncmov [#allocation3 + $0x1] }
 0x22f   :  { %s1393_s6 = vpop.sfrf %1392 }
 0x230   :  { %p1457_p3 = scmp.ne.s32.totalorder %s1393_s6, 0 }
 0x232   :  { %1397 = shalt.err (%p1457_p3)  }

</bundles_post_ra>
